<compile_context>
chip_gen: v7x
topology: tpu7x:2x2x1
jax: 0.10.0
libtpu: 0.0.40
codegen_flags: <defaults>
</compile_context>

<pallas_src>
import functools
import math

import jax
import jax.numpy as jnp
import numpy as np
from jax import lax
from jax.experimental import pallas as pl
from jax.experimental.pallas import tpu as pltpu


def _pe_kernel(idt_ref, off_ref, wy_ref, wx_ref, wu_ref, b_ref, out_ref,
               *, Hp, Wp, tile_h, scale):
    """Computes one (channel-tile, row-tile) NCHW output block (batch-free).

    idt_ref : (h, 1)        1 / temperature**(2*(j//2)/h)
    off_ref : (h, 1)        phase offsets {0, pi/2}   (sin(x+pi/2) == cos(x))
    wy_ref  : (tile_d, h)   conv-weight columns for pos_y features
    wx_ref  : (tile_d, h)   conv-weight columns for pos_x features
    wu_ref  : (tile_d, 2)   conv-weight columns for [y_unscaled, x_unscaled]
    b_ref   : (tile_d, 1)   conv bias
    out_ref : (tile_d, tile_h, Wp)
    """
    hi = pl.program_id(1)

    inv_hp = 1.0 / float(Hp)
    inv_wp = 1.0 / float(Wp)
    inv_scale = 1.0 / float(scale)
    two_scale = 2.0 * float(scale)

    # Row / column embeddings (mask=None path: cumsum of ones == index + 1),
    # built from lane-dense (1, k) iotas — no integer div/mod.
    row0 = (hi * tile_h).astype(jnp.float32)
    y_idx = lax.broadcasted_iota(jnp.int32, (1, tile_h), 1).astype(jnp.float32) + row0
    x_idx = lax.broadcasted_iota(jnp.int32, (1, Wp), 1).astype(jnp.float32)
    y_emb = ((y_idx + 0.5) * inv_hp - 0.5) * two_scale        # (1, tile_h)
    x_emb = ((x_idx + 0.5) * inv_wp - 0.5) * two_scale        # (1, Wp)

    idt = idt_ref[...]                                        # (h, 1)
    off = off_ref[...]                                        # (h, 1)
    # Interleaved sin/cos features (separable: per-row and per-column only).
    feat_y = jnp.sin(idt * y_emb + off)                       # (h, tile_h)
    feat_x = jnp.sin(idt * x_emb + off)                       # (h, Wp)

    prec = jax.lax.Precision.HIGHEST   # tiny K=h matmuls; off the critical path
    # Per-row / per-column projected contributions; rank-1 unscaled terms and
    # the conv bias ride along for free on these small operands.
    ayt = jnp.dot(wy_ref[...], feat_y,
                  preferred_element_type=jnp.float32, precision=prec)
    ayt = ayt + wu_ref[:, 0:1] * (y_emb * inv_scale) + b_ref[...]   # (tile_d, tile_h)
    axt = jnp.dot(wx_ref[...], feat_x,
                  preferred_element_type=jnp.float32, precision=prec)
    axt = axt + wu_ref[:, 1:2] * (x_emb * inv_scale)                # (tile_d, Wp)

    # VPU broadcast-add expansion (no MXU selection matmuls, no big temporaries):
    #   out[d, r, c] = ayt[d, r] + axt[d, c]
    out_ref[...] = (ayt[:, :, None] + axt[:, None, :]).astype(out_ref.dtype)


class PositionalEncodingFourierv2:
    """JAX/Pallas port of the PyTorch module (projection=True, mask=None path)."""

    def __init__(self, hidden_dim=64, dim=768, temperature=10000,
                 scale_factor=32, key=None):
        assert hidden_dim % 2 == 0
        self.hidden_dim = hidden_dim
        self.dim = dim
        self.temperature = float(temperature)
        self.scale = math.pi * scale_factor
        enc_dim = (hidden_dim + 1) * 2
        self.enc_dim = enc_dim

        # Deterministic Conv2d(enc_dim, dim, 1) init (uniform +-1/sqrt(fan_in)).
        if key is None:
            key = jax.random.PRNGKey(0)
        kw, kb = jax.random.split(key)
        bound = 1.0 / math.sqrt(enc_dim)
        self.weight = jax.random.uniform(kw, (dim, enc_dim), jnp.float32, -bound, bound)
        self.bias = jax.random.uniform(kb, (dim,), jnp.float32, -bound, bound)

        # Hoisted: split the conv weight once into the column blocks the kernel
        # consumes, and precompute 1/dim_t + phase offsets.
        h = hidden_dim
        self.w_y = self.weight[:, :h]                    # (dim, h)   pos_y cols
        self.w_x = self.weight[:, h:2 * h]               # (dim, h)   pos_x cols
        self.w_u = self.weight[:, 2 * h:2 * h + 2]       # (dim, 2)   [y_un, x_un]
        self.bias_col = self.bias[:, None]               # (dim, 1)
        j = np.arange(h, dtype=np.float32)
        dim_t = self.temperature ** (2.0 * np.floor(j / 2.0) / float(h))
        self.inv_dim_t = jnp.asarray((1.0 / dim_t)[:, None].astype(np.float32))   # (h,1)
        self.phase_off = jnp.asarray(
            ((j % 2.0) * (math.pi / 2.0))[:, None].astype(np.float32))            # (h,1)

    # --- tile sizing helpers -------------------------------------------------
    @staticmethod
    def _pick_tile_d(dim, target=256):
        for t in range(min(dim, target), 0, -1):
            if dim % t == 0 and (t % 8 == 0 or t == dim):
                return t
        return dim

    @staticmethod
    def _pick_tile_h(Hp, Wp, tile_d, target_bytes=2 * 1024 * 1024):
        # tile_h must divide Hp and be 8-aligned (or full Hp); keep the padded
        # f32 output block (lane dim padded to 128) ~2 MiB so two pipeline
        # buffers fit under every generation's default scoped VMEM (incl. v7x).
        def padded_bytes(th):
            return tile_d * (-(-th // 8) * 8) * (-(-Wp // 128) * 128) * 4

        valid = [th for th in range(1, Hp + 1)
                 if Hp % th == 0 and (th % 8 == 0 or th == Hp)]
        fitting = [th for th in valid if padded_bytes(th) <= target_bytes]
        return max(fitting) if fitting else min(valid)

    def __call__(self, B, Hp, Wp, mask=None):
        # TODO(synk): only the mask=None default branch is implemented; a user
        # supplied boolean mask (masked-cumsum normalization) is not supported.
        assert mask is None, "mask-supplied path not implemented"
        h = self.hidden_dim
        dim = self.dim
        tile_d = self._pick_tile_d(dim)
        tile_h = self._pick_tile_h(Hp, Wp, tile_d)

        # v7x megacore: ensure >= 2 parallel grid steps when possible so both
        # TensorCores get work (prefer splitting the channel axis).
        if (dim // tile_d) * (Hp // tile_h) < 2 and dim >= 16:
            tile_d2 = self._pick_tile_d(dim, target=max(8, dim // 2))
            if dim // tile_d2 >= 2:
                tile_d = tile_d2

        n_d = dim // tile_d
        n_h = Hp // tile_h

        kernel = functools.partial(_pe_kernel, Hp=Hp, Wp=Wp, tile_h=tile_h,
                                   scale=self.scale)

        def const_spec(shape):
            return pl.BlockSpec(shape, lambda di, hi: (0, 0))

        def wtile_spec(last):
            return pl.BlockSpec((tile_d, last), lambda di, hi: (di, 0))

        # Batch-free output: the encoding is identical for every batch element
        # on the mask=None path; compute once, broadcast outside.
        pe = pl.pallas_call(
            kernel,
            out_shape=jax.ShapeDtypeStruct((dim, Hp, Wp), jnp.float32),
            grid=(n_d, n_h),
            in_specs=[
                const_spec((h, 1)),             # inv_dim_t
                const_spec((h, 1)),             # phase offsets
                wtile_spec(h),                  # w_y
                wtile_spec(h),                  # w_x
                wtile_spec(2),                  # w_u
                wtile_spec(1),                  # bias
            ],
            out_specs=pl.BlockSpec((tile_d, tile_h, Wp),
                                   lambda di, hi: (di, hi, 0)),
            compiler_params=pltpu.CompilerParams(
                dimension_semantics=("parallel", "parallel")),
        )(self.inv_dim_t, self.phase_off,
          self.w_y, self.w_x, self.w_u, self.bias_col)

        # NOTE: result is a broadcast view; downstream code must not mutate the
        # PE buffer per batch element (no donation / in-place add into it).
        return jnp.broadcast_to(pe[None], (B, dim, Hp, Wp))


def _reference(B, Hp, Wp, weight, bias, hidden_dim, temperature, scale):
    """Pure-JAX transcription of the PyTorch forward (mask=None) for checking."""
    not_mask = jnp.ones((B, Hp, Wp), jnp.float32)
    y_embed = jnp.cumsum(not_mask, axis=1)
    x_embed = jnp.cumsum(not_mask, axis=2)
    y_embed = ((y_embed - 0.5) / y_embed[:, -1:, :] - 0.5) * 2 * scale
    x_embed = ((x_embed - 0.5) / x_embed[:, :, -1:] - 0.5) * 2 * scale
    yx_un = jnp.stack([y_embed, x_embed], axis=-1) / scale
    dim_t = jnp.arange(hidden_dim, dtype=jnp.float32)
    dim_t = temperature ** (2 * jnp.floor_divide(dim_t, 2) / hidden_dim)
    pos_x = x_embed[..., None] / dim_t
    pos_y = y_embed[..., None] / dim_t
    pos_x = jnp.stack((jnp.sin(pos_x[..., 0::2]), jnp.cos(pos_x[..., 1::2])),
                      axis=4).reshape(B, Hp, Wp, hidden_dim)
    pos_y = jnp.stack((jnp.sin(pos_y[..., 0::2]), jnp.cos(pos_y[..., 1::2])),
                      axis=4).reshape(B, Hp, Wp, hidden_dim)
    pos = jnp.concatenate((pos_y, pos_x, yx_un), axis=3)        # (B,Hp,Wp,enc_dim)
    out = jnp.einsum('bhwc,dc->bdhw', pos, weight,
                     precision=jax.lax.Precision.HIGHEST)
    return out + bias[None, :, None, None]


if __name__ == "__main__":
    B, Hp, Wp = 2, 16, 16
    hidden_dim, dim = 32, 64

    key = jax.random.PRNGKey(0)
    module = PositionalEncodingFourierv2(hidden_dim=hidden_dim, dim=dim, key=key)

    out = module(B, Hp, Wp)
    out = jax.block_until_ready(out)
    assert out.shape == (B, dim, Hp, Wp), out.shape

    ref = _reference(B, Hp, Wp, module.weight, module.bias,
                     hidden_dim, module.temperature, module.scale)
    ref = jax.block_until_ready(ref)
    np.testing.assert_allclose(np.asarray(out), np.asarray(ref),
                               rtol=1e-3, atol=1e-3)
    print("KERNEL_OK")
</pallas_src>

<mosaic_0001>
module attributes {stable_mosaic.version = 11 : i64} {
  func.func @_pe_kernel(%arg0: i32, %arg1: i32, %arg2: memref<32x1xf32, #tpu.memory_space<vmem>>, %arg3: memref<32x1xf32, #tpu.memory_space<vmem>>, %arg4: memref<32x32xf32, #tpu.memory_space<vmem>>, %arg5: memref<32x32xf32, #tpu.memory_space<vmem>>, %arg6: memref<32x2xf32, #tpu.memory_space<vmem>>, %arg7: memref<32x1xf32, #tpu.memory_space<vmem>>, %arg8: memref<32x16x16xf32, #tpu.memory_space<vmem>>) attributes {dimension_semantics = [#tpu.dimension_semantics<parallel>, #tpu.dimension_semantics<parallel>], iteration_bounds = array<i64: 2, 1>, scalar_prefetch = 0 : i64, scratch_operands = 0 : i64, tpu.core_type = #tpu.core_type<tc>, window_params = [{pipeline_mode = #tpu.pipeline_mode<synchronous>, transform_indices = @transform_0, window_bounds = array<i64: 32, 1>}, {pipeline_mode = #tpu.pipeline_mode<synchronous>, transform_indices = @transform_1, window_bounds = array<i64: 32, 1>}, {transform_indices = @transform_2, window_bounds = array<i64: 32, 32>}, {transform_indices = @transform_3, window_bounds = array<i64: 32, 32>}, {transform_indices = @transform_4, window_bounds = array<i64: 32, 2>}, {transform_indices = @transform_5, window_bounds = array<i64: 32, 1>}, {transform_indices = @transform_6, window_bounds = array<i64: 32, 16, 16>}]} {
    %c16_i32 = arith.constant 16 : i32
    %0 = arith.muli %arg1, %c16_i32 : i32
    %1 = arith.sitofp %0 : i32 to f32
    %2 = tpu.iota {dimensions = array<i32: 1>} : vector<1x16xi32>
    %3 = arith.sitofp %2 : vector<1x16xi32> to vector<1x16xf32>
    %4 = vector.broadcast %1 : f32 to vector<1x16xf32>
    %5 = arith.addf %3, %4 : vector<1x16xf32>
    %6 = tpu.iota {dimensions = array<i32: 1>} : vector<1x16xi32>
    %7 = arith.sitofp %6 : vector<1x16xi32> to vector<1x16xf32>
    %cst = arith.constant 5.000000e-01 : f32
    %8 = vector.broadcast %cst : f32 to vector<1x16xf32>
    %9 = arith.addf %5, %8 : vector<1x16xf32>
    %cst_0 = arith.constant 6.250000e-02 : f32
    %10 = vector.broadcast %cst_0 : f32 to vector<1x16xf32>
    %11 = arith.mulf %9, %10 : vector<1x16xf32>
    %cst_1 = arith.constant 5.000000e-01 : f32
    %12 = vector.broadcast %cst_1 : f32 to vector<1x16xf32>
    %13 = arith.subf %11, %12 : vector<1x16xf32>
    %cst_2 = arith.constant 201.061935 : f32
    %14 = vector.broadcast %cst_2 : f32 to vector<1x16xf32>
    %15 = arith.mulf %13, %14 : vector<1x16xf32>
    %cst_3 = arith.constant 5.000000e-01 : f32
    %16 = vector.broadcast %cst_3 : f32 to vector<1x16xf32>
    %17 = arith.addf %7, %16 : vector<1x16xf32>
    %cst_4 = arith.constant 6.250000e-02 : f32
    %18 = vector.broadcast %cst_4 : f32 to vector<1x16xf32>
    %19 = arith.mulf %17, %18 : vector<1x16xf32>
    %cst_5 = arith.constant 5.000000e-01 : f32
    %20 = vector.broadcast %cst_5 : f32 to vector<1x16xf32>
    %21 = arith.subf %19, %20 : vector<1x16xf32>
    %cst_6 = arith.constant 201.061935 : f32
    %22 = vector.broadcast %cst_6 : f32 to vector<1x16xf32>
    %23 = arith.mulf %21, %22 : vector<1x16xf32>
    %c0 = arith.constant 0 : index
    %c0_7 = arith.constant 0 : index
    %24 = vector.load %arg2[%c0, %c0_7] : memref<32x1xf32, #tpu.memory_space<vmem>>, vector<32x1xf32>
    %c0_8 = arith.constant 0 : index
    %c0_9 = arith.constant 0 : index
    %25 = vector.load %arg3[%c0_8, %c0_9] : memref<32x1xf32, #tpu.memory_space<vmem>>, vector<32x1xf32>
    %26 = vector.broadcast %24 : vector<32x1xf32> to vector<32x16xf32>
    %27 = vector.broadcast %15 : vector<1x16xf32> to vector<32x16xf32>
    %28 = arith.mulf %26, %27 : vector<32x16xf32>
    %29 = vector.broadcast %25 : vector<32x1xf32> to vector<32x16xf32>
    %30 = arith.addf %28, %29 : vector<32x16xf32>
    %31 = math.sin %30 : vector<32x16xf32>
    %32 = vector.broadcast %24 : vector<32x1xf32> to vector<32x16xf32>
    %33 = vector.broadcast %23 : vector<1x16xf32> to vector<32x16xf32>
    %34 = arith.mulf %32, %33 : vector<32x16xf32>
    %35 = vector.broadcast %25 : vector<32x1xf32> to vector<32x16xf32>
    %36 = arith.addf %34, %35 : vector<32x16xf32>
    %37 = math.sin %36 : vector<32x16xf32>
    %c0_10 = arith.constant 0 : index
    %c0_11 = arith.constant 0 : index
    %38 = vector.load %arg4[%c0_10, %c0_11] : memref<32x32xf32, #tpu.memory_space<vmem>>, vector<32x32xf32>
    %cst_12 = arith.constant dense<0.000000e+00> : vector<32x16xf32>
    %39 = tpu.matmul %38, %31, %cst_12 {dimension_numbers = #tpu.dot_dimension_numbers<[1], [0], [0], [1], [0, 0, 1, 1], [], []>, precision = #tpu.contract_precision<fp32>} : vector<32x32xf32>, vector<32x16xf32>, vector<32x16xf32> -> vector<32x16xf32>
    %c0_13 = arith.constant 0 : index
    %c0_14 = arith.constant 0 : index
    %40 = vector.load %arg6[%c0_13, %c0_14] : memref<32x2xf32, #tpu.memory_space<vmem>>, vector<32x1xf32>
    %cst_15 = arith.constant 0.00994718354 : f32
    %41 = vector.broadcast %cst_15 : f32 to vector<1x16xf32>
    %42 = arith.mulf %15, %41 : vector<1x16xf32>
    %43 = vector.broadcast %40 : vector<32x1xf32> to vector<32x16xf32>
    %44 = vector.broadcast %42 : vector<1x16xf32> to vector<32x16xf32>
    %45 = arith.mulf %43, %44 : vector<32x16xf32>
    %46 = arith.addf %39, %45 : vector<32x16xf32>
    %c0_16 = arith.constant 0 : index
    %c0_17 = arith.constant 0 : index
    %47 = vector.load %arg7[%c0_16, %c0_17] : memref<32x1xf32, #tpu.memory_space<vmem>>, vector<32x1xf32>
    %48 = vector.broadcast %47 : vector<32x1xf32> to vector<32x16xf32>
    %49 = arith.addf %46, %48 : vector<32x16xf32>
    %c0_18 = arith.constant 0 : index
    %c0_19 = arith.constant 0 : index
    %50 = vector.load %arg5[%c0_18, %c0_19] : memref<32x32xf32, #tpu.memory_space<vmem>>, vector<32x32xf32>
    %cst_20 = arith.constant dense<0.000000e+00> : vector<32x16xf32>
    %51 = tpu.matmul %50, %37, %cst_20 {dimension_numbers = #tpu.dot_dimension_numbers<[1], [0], [0], [1], [0, 0, 1, 1], [], []>, precision = #tpu.contract_precision<fp32>} : vector<32x32xf32>, vector<32x16xf32>, vector<32x16xf32> -> vector<32x16xf32>
    %c0_21 = arith.constant 0 : index
    %c1 = arith.constant 1 : index
    %52 = vector.load %arg6[%c0_21, %c1] : memref<32x2xf32, #tpu.memory_space<vmem>>, vector<32x1xf32>
    %cst_22 = arith.constant 0.00994718354 : f32
    %53 = vector.broadcast %cst_22 : f32 to vector<1x16xf32>
    %54 = arith.mulf %23, %53 : vector<1x16xf32>
    %55 = vector.broadcast %52 : vector<32x1xf32> to vector<32x16xf32>
    %56 = vector.broadcast %54 : vector<1x16xf32> to vector<32x16xf32>
    %57 = arith.mulf %55, %56 : vector<32x16xf32>
    %58 = arith.addf %51, %57 : vector<32x16xf32>
    %59 = vector.shape_cast %49 : vector<32x16xf32> to vector<32x16x1xf32>
    %60 = vector.shape_cast %58 : vector<32x16xf32> to vector<32x1x16xf32>
    %61 = vector.broadcast %59 : vector<32x16x1xf32> to vector<32x16x16xf32>
    %62 = vector.broadcast %60 : vector<32x1x16xf32> to vector<32x16x16xf32>
    %63 = arith.addf %61, %62 : vector<32x16x16xf32>
    %c0_23 = arith.constant 0 : index
    %c0_24 = arith.constant 0 : index
    %c0_25 = arith.constant 0 : index
    %64 = vector.load %arg8[%c0_23, %c0_24, %c0_25] : memref<32x16x16xf32, #tpu.memory_space<vmem>>, vector<32x16x16xf32>
    tpu.vector_store %arg8[%c0_23, %c0_24, %c0_25], %63 {strides = array<i32>} : memref<32x16x16xf32, #tpu.memory_space<vmem>>, vector<32x16x16xf32>,
    return
  }
  func.func @transform_0(%arg0: i32, %arg1: i32) -> (i32, i32) {
    %c0_i32 = arith.constant 0 : i32
    %c0_i32_0 = arith.constant 0 : i32
    %c0_i32_1 = arith.constant 0 : i32
    return %c0_i32, %c0_i32_0 : i32, i32
  }
  func.func @transform_1(%arg0: i32, %arg1: i32) -> (i32, i32) {
    %c0_i32 = arith.constant 0 : i32
    %c0_i32_0 = arith.constant 0 : i32
    %c0_i32_1 = arith.constant 0 : i32
    return %c0_i32, %c0_i32_0 : i32, i32
  }
  func.func @transform_2(%arg0: i32, %arg1: i32) -> (i32, i32) {
    %c0_i32 = arith.constant 0 : i32
    %c0_i32_0 = arith.constant 0 : i32
    return %arg0, %c0_i32 : i32, i32
  }
  func.func @transform_3(%arg0: i32, %arg1: i32) -> (i32, i32) {
    %c0_i32 = arith.constant 0 : i32
    %c0_i32_0 = arith.constant 0 : i32
    return %arg0, %c0_i32 : i32, i32
  }
  func.func @transform_4(%arg0: i32, %arg1: i32) -> (i32, i32) {
    %c0_i32 = arith.constant 0 : i32
    %c0_i32_0 = arith.constant 0 : i32
    return %arg0, %c0_i32 : i32, i32
  }
  func.func @transform_5(%arg0: i32, %arg1: i32) -> (i32, i32) {
    %c0_i32 = arith.constant 0 : i32
    %c0_i32_0 = arith.constant 0 : i32
    return %arg0, %c0_i32 : i32, i32
  }
  func.func @transform_6(%arg0: i32, %arg1: i32) -> (i32, i32, i32) {
    %c0_i32 = arith.constant 0 : i32
    %c0_i32_0 = arith.constant 0 : i32
    return %arg0, %arg1, %c0_i32 : i32, i32, i32
  }
}

</mosaic_0001>

<bundles_post_ra>
// kernel: tpu_custom_call.1
= control target key start
LH: loop header
LB: loop body
LE: loop exit
PB: predicated region body
PF: predicated region fallthrough
CT: control target
= control target key end

     0   :  { %s4155_s21 = smov 0   ;;  %s4157_s22 = smov 0   ;;  %s5249_s0 = inlined_call_operand.vmem [shape: f32[32,1], index: 0, kind: input, shape index: {}]   ;;  %s5250_s1 = inlined_call_operand.vmem [shape: f32[32,1], index: 1, kind: input, shape index: {}]   ;;  %s5251_s2 = inlined_call_operand.vmem [shape: f32[64,32], index: 2, kind: input, shape index: {}]   ;;  %s5252_s3 = inlined_call_operand.vmem [shape: f32[64,32], index: 3, kind: input, shape index: {}]   ;;  %s5253_s4 = inlined_call_operand.vmem [shape: f32[64,2], index: 4, kind: input, shape index: {}]   ;;  %s5254_s5 = inlined_call_operand.vmem [shape: f32[64,1], index: 5, kind: input, shape index: {}]   ;;  %s5255_s6 = inlined_call_operand.vmem [shape: f32[64,16,16], index: 6, kind: output, shape index: {}]  }
   0x1   :  { %s4159_s23 = smov 0  }
   0x2 LB: > { %s28_s24 = sadd.s32 1, %s4105_s22  ;;  %p3561_p0 = scmp.ge.s32.totalorder %s4109_s23, 1  ;;  %s4109_s23 = sphi %s4159_s23, %s16_s23   ;;  %s4105_s22 = sphi %s4157_s22, %s5268_s22   ;;  %s4101_s21 = sphi %s4155_s21, %s5267_s21  }
   0x3   : > { %p30_p1 = scmp.ge.s32.totalorder %s28_s24, 2  ;;  %p260_p2 = scmp.lt.s32.totalorder %s4109_s23, 3 }
   0x5   : > { %s5270_s24 = smov (%p30_p1, %s28_s24), 0  ;;  %p261_p3 = pnand %p3561_p0, %p260_p2 }
   0x7   : > { %264 = sbr.rel (%p261_p3) target bundleno = 797 (0x31d), region = 44 }
   0xe   : > { %v365_v0 = vld [vmem:[%s5250_s1] sm:$0xff]  ;;  %s3562_s29 = sshll.u32 %s4101_s21, 2  ;;  %v4111_v2 = vmov 0   ;;  %v366_v3 = vld [vmem:[%s5250_s1 + $0x8] sm:$0xff]  ;;  %v364_v5 = vld [vmem:[%s5249_s0 + $0x18] sm:$0xff]  ;;  %v348_v17 = vlaneseq  ;;  %s3570_s11 = sshll.u32 %s4101_s21, 5 }
   0xf   : > { %v361_v1 = vld [vmem:[%s5249_s0] sm:$0xff]  ;;  %4068 = vset.pattern.permute.xlu1 %v4111_v2  ;;  %4067 = vset.pattern.permute.xlu0 %v4111_v2  ;;  %p311_p4 = scmp.lt.s32.totalorder %s3562_s29, 7  ;;  %v362_v4 = vld [vmem:[%s5249_s0 + $0x8] sm:$0xff]  ;;  %v363_v6 = vld [vmem:[%s5249_s0 + $0x10] sm:$0xff]  ;;  %v4112_v54 = vmov 683565275  }
  0x10   : > { %395 = vperm.xlu1 %4068, %v365_v0   ;;  %371 = vperm.xlu0 %4067, %v361_v1   ;;  %v368_v7 = vld [vmem:[%s5250_s1 + $0x18] sm:$0xff]  ;;  %v367_v8 = vld [vmem:[%s5250_s1 + $0x10] sm:$0xff]  ;;  %v349_v18 = vand.u32 127, %v348_v17  ;;  %v4113_v56 = vmov 2475754826   ;;  %p336_p5 = scmp.lt.s32.totalorder %s3570_s11, 63 }
  0x11   : > { %s5272_s29 = smov (!%p311_p4, %s3562_s29), 7  ;;  %v4114_v59 = vmov 2131351028   ;;  %v4115_v61 = vmov 2102212464  }
  0x12   : > { %s4194_s14 = sshll.u32 %s5272_s29, 3  ;;  %v350_v19 = vcvt.s32.f32 %v349_v18  ;;  %v4116_v63 = vmov 920167782   ;;  %s5274_s11 = smov (!%p336_p5, %s3570_s11), 63 }
  0x13   : > { %s326_s25 = scalar_lea.vmem %s5253_s4, %s4194_s14  ;;  %s332_s28 = scalar_lea.vmem %s5254_s5, %s4194_s14 }
  0x14   : > { %400 = vperm.xlu1 %4068, %v366_v3   ;;  %376 = vperm.xlu0 %4067, %v362_v4   ;;  %v4206_v9 = vld [vmem:[%s326_s25 + $0x8] sm:$0xff]  ;;  %v4208_v10 = vld [vmem:[%s326_s25] sm:$0xff]  ;;  %v4212_v11 = vld [vmem:[%s326_s25 + $0x18] sm:$0xff]  ;;  %v353_v20 = vadd.f32 0.5, %v350_v19  ;;  %s4471_s7 = scalar_lea.vmem %s5251_s2, %s4194_s14  ;;  %s4483_s10 = scalar_lea.vmem %s5252_s3, %s4194_s14 }
  0x15   : > { %v4214_v12 = vld [vmem:[%s326_s25 + $0x10] sm:$0xff]  ;;  %v1918_v13 = vld [vmem:[%s332_s28 + $0x8] sm:$0xff]  ;;  %v1917_v14 = vld [vmem:[%s332_s28] sm:$0xff]  ;;  %s3609_s12 = sshll.u32 %s5274_s11, 4 }
  0x16   : > { %v1920_v15 = vld [vmem:[%s332_s28 + $0x18] sm:$0xff]  ;;  %v1919_v16 = vld [vmem:[%s332_s28 + $0x10] sm:$0xff]  ;;  %v354_v21 = vmul.f32 0.0625, %v353_v20  ;;  %s5040_s15 = scalar_lea.vmem %s5255_s6, %s3609_s12 }
  0x18   : > { %386 = vperm.xlu1 %4068, %v364_v5   ;;  %381 = vperm.xlu0 %4067, %v363_v6   ;;  %v3573_v22 = vadd.f32 -0.5, %v354_v21  ;;  %v4117_v6 = vmov 1326507024  }
  0x1a   : > { %v4223_v23 = vmul.f32 201.06194, %v3573_v22 }
  0x1c   : > { %410 = vperm.xlu1 %4068, %v368_v7   ;;  %405 = vperm.xlu0 %4067, %v367_v8  }
  0x20   : > { %1273 = vperm.xlu1 %4068, %v4206_v9   ;;  %1268 = vperm.xlu0 %4067, %v4208_v10  }
  0x24   : > { %1283 = vperm.xlu1 %4068, %v4212_v11   ;;  %1278 = vperm.xlu0 %4067, %v4214_v12  }
  0x28   : > { %1928 = vperm.xlu1 %4068, %v1918_v13   ;;  %1923 = vperm.xlu0 %4067, %v1917_v14  }
  0x2c   : > { %1938 = vperm.xlu1 %4068, %v1920_v15   ;;  %1933 = vperm.xlu0 %4067, %v1919_v16  }
  0x8f   : > { %v396_v24 = vpop.permute.xlu1 %395  ;;  %v372_v25 = vpop.permute.xlu0 %371 }
  0x90   : > { %v389_v26 = vmul.f32 %v372_v25, %v4223_v23 }
  0x92   : > { %v4226_v27 = vadd.f32 %v396_v24, %v389_v26 }
  0x93   : > { %v401_v28 = vpop.permute.xlu1 %400  ;;  %v377_v29 = vpop.permute.xlu0 %376 }
  0x94   : > { %v417_v30 = vand.u32 2147483647, %v4226_v27  ;;  %v420_v31 = vand.u32 2139095040, %v4226_v27  ;;  %v390_v32 = vmul.f32 %v377_v29, %v4223_v23  ;;  %vm419_vm13 = vcmp.lt.s32.totalorder %v4226_v27, 0 }
  0x96   : > { %v421_v33 = vshrl.u32 %v420_v31, 23  ;;  %v424_v34 = vand.u32 8388607, %v417_v30  ;;  %v4233_v35 = vadd.f32 %v401_v28, %v390_v32  ;;  %vm4333_vm14 = vcmp.le.f32.partialorder %v417_v30, 0.7853982 }
  0x97   : > { %v387_v36 = vpop.permute.xlu1 %386 }
  0x98   : > { %v3575_v37 = vadd.s32 4294967169, %v421_v33  ;;  %v521_v38 = vand.u32 2147483647, %v4233_v35  ;;  %v524_v39 = vand.u32 2139095040, %v4233_v35  ;;  %v425_v41 = vor.u32 8388608, %v424_v34 }
  0x99   : > { %v392_v47 = vmul.f32 %v387_v36, %v4223_v23  ;;  %vm523_vm15 = vcmp.lt.s32.totalorder %v4233_v35, 0 }
  0x9a   : > { %v427_v40 = vadd.s32 1, %v3575_v37  ;;  %v525_v42 = vshrl.u32 %v524_v39, 23  ;;  %v528_v43 = vand.u32 8388607, %v521_v38  ;;  %v4240_v50 = vshll.u32 %v425_v41, 8 }
  0x9b   : > { %v411_v44 = vpop.permute.xlu1 %410 }
  0x9c   : > { %vm428_vm0 = vcmp.gt.s32.totalorder %v427_v40, 0  ;;  %v3579_v46 = vadd.s32 4294967169, %v525_v42  ;;  %v529_v51 = vor.u32 8388608, %v528_v43  ;;  %v4242_v52 = vadd.f32 %v411_v44, %v392_v47 }
  0x9d   : > { %v429_v45 = vsel %vm428_vm0, %v427_v40, 0 }
  0x9e   : > { %v430_v48 = vshrl.u32 %v429_v45, 5  ;;  %v431_v49 = vand.u32 31, %v429_v45  ;;  %v531_v58 = vadd.s32 1, %v3579_v46  ;;  %v4264_v37 = vshll.u32 %v529_v51, 8 }
  0x9f   : > { %v732_v45 = vand.u32 2139095040, %v4242_v52 }
  0xa0   : > { %v432_v53 = vsub.s32 32, %v431_v49  ;;  %v434_v55 = vshll.u32 %v4112_v54, %v431_v49  ;;  %v437_v57 = vshll.u32 %v4113_v56, %v431_v49  ;;  %v440_v60 = vshll.u32 %v4114_v59, %v431_v49 }
  0xa1   : > { %v443_v62 = vshll.u32 %v4115_v61, %v431_v49  ;;  %v446_v0 = vshll.u32 %v4116_v63, %v431_v49  ;;  %vm449_vm1 = vcmp.lt.s32.totalorder %v430_v48, 1  ;;  %vm450_vm2 = vcmp.lt.s32.totalorder %v430_v48, 2 }
  0xa2   : > { %v435_v1 = vshrl.u32 %v4113_v56, %v432_v53  ;;  %v438_v2 = vshrl.u32 %v4114_v59, %v432_v53  ;;  %v441_v3 = vshrl.u32 %v4115_v61, %v432_v53  ;;  %v433_v4 = vshrl.u32 %v4112_v54, %v432_v53 }
  0xa3   : > { %v444_v5 = vshrl.u32 %v4116_v63, %v432_v53  ;;  %v447_v7 = vshrl.u32 %v4117_v6, %v432_v53  ;;  %vm451_vm3 = vcmp.lt.s32.totalorder %v430_v48, 3  ;;  %vm532_vm4 = vcmp.gt.s32.totalorder %v531_v58, 0 }
  0xa4   : > { %v436_v8 = vor.u32 %v435_v1, %v434_v55  ;;  %v439_v13 = vor.u32 %v438_v2, %v437_v57  ;;  %v442_v14 = vor.u32 %v441_v3, %v440_v60  ;;  %vm452_vm5 = vcmp.lt.s32.totalorder %v430_v48, 4 }
  0xa5   : > { %v445_v15 = vor.u32 %v444_v5, %v443_v62  ;;  %v448_v16 = vor.u32 %v447_v7, %v446_v0  ;;  %v533_v18 = vsel %vm532_vm4, %v531_v58, 0  ;;  %vm4356_vm4 = vcmp.le.f32.partialorder %v521_v38, 0.7853982 }
  0xa6   : > { %v453_v19 = vsel %vm449_vm1, %v433_v4, %v436_v8  ;;  %v454_v20 = vsel %vm452_vm5, %v442_v14, 2102212464  ;;  %v457_v21 = vsel %vm449_vm1, %v436_v8, %v439_v13  ;;  %v461_v22 = vsel %vm449_vm1, %v439_v13, %v442_v14 }
  0xa7   : > { %v455_v24 = vsel %vm451_vm3, %v439_v13, %v454_v20  ;;  %v458_v25 = vsel %vm452_vm5, %v445_v15, 920167782  ;;  %v462_v26 = vsel %vm452_vm5, %v448_v16, 1326507024  ;;  %v534_v28 = vshrl.u32 %v533_v18, 5 }
  0xa8   : > { %v456_v29 = vsel %vm450_vm2, %v453_v19, %v455_v24  ;;  %v459_v31 = vsel %vm451_vm3, %v442_v14, %v458_v25  ;;  %v463_v32 = vsel %vm451_vm3, %v445_v15, %v462_v26  ;;  %v535_v33 = vand.u32 31, %v533_v18  ;;  %v382_v14 = vpop.permute.xlu0 %381 }
  0xa9   : > { %v460_v34 = vsel %vm450_vm2, %v457_v21, %v459_v31  ;;  %v464_v36 = vsel %vm450_vm2, %v461_v22, %v463_v32  ;;  %v472_v43 = vmul.u32 %v4240_v50, %v456_v29  ;;  %vm553_vm6 = vcmp.lt.s32.totalorder %v534_v28, 1 }
  0xaa   : > { %v4267_v39 = vmul.u32.u64.low %v4240_v50, %v464_v36  ;;  %v4268_v40 = vmul.u32.u64.high %v4240_v50, %v464_v36, %v4267_v39  ;;  %v4271_v41 = vmul.u32.u64.low %v4240_v50, %v460_v34  ;;  %v4272_v42 = vmul.u32.u64.high %v4240_v50, %v460_v34, %v4271_v41 }
  0xab   : > { %v536_v44 = vsub.s32 32, %v535_v33  ;;  %v538_v46 = vshll.u32 %v4112_v54, %v535_v33  ;;  %v541_v47 = vshll.u32 %v4113_v56, %v535_v33  ;;  %v544_v48 = vshll.u32 %v4114_v59, %v535_v33 }
  0xac   : > { %v547_v49 = vshll.u32 %v4115_v61, %v535_v33  ;;  %v550_v50 = vshll.u32 %v4116_v63, %v535_v33  ;;  %vm474_vm7 = vc.u32 %v4268_v40, %v4271_v41  ;;  %v475_v57 = vadd.s32 1, %v4272_v42 }
  0xad   : > { %v539_v51 = vshrl.u32 %v4113_v56, %v536_v44  ;;  %v542_v53 = vshrl.u32 %v4114_v59, %v536_v44  ;;  %v545_v55 = vshrl.u32 %v4115_v61, %v536_v44  ;;  %v548_v58 = vshrl.u32 %v4116_v63, %v536_v44 }
  0xae   : > { %vm554_vm8 = vcmp.lt.s32.totalorder %v534_v28, 2  ;;  %v551_v1 = vshrl.u32 %v4117_v6, %v536_v44  ;;  %v476_v2 = vsel %vm474_vm7, %v475_v57, %v4272_v42  ;;  %vm556_vm9 = vcmp.lt.s32.totalorder %v534_v28, 4 }
  0xaf   : > { %v540_v60 = vor.u32 %v539_v51, %v538_v46  ;;  %v543_v62 = vor.u32 %v542_v53, %v541_v47  ;;  %v546_v0 = vor.u32 %v545_v55, %v544_v48  ;;  %v549_v3 = vor.u32 %v548_v58, %v547_v49  ;;  %v406_v46 = vpop.permute.xlu0 %405 }
  0xb0   : > { %v733_v4 = vshrl.u32 %v732_v45, 23  ;;  %v477_v5 = vadd.s32 %v476_v2, %v472_v43  ;;  %v537_v7 = vshrl.u32 %v4112_v54, %v536_v44  ;;  %v552_v8 = vor.u32 %v551_v1, %v550_v50 }
  0xb1   : > { %v558_v13 = vsel %vm556_vm9, %v546_v0, 2102212464  ;;  %vm555_vm10 = vcmp.lt.s32.totalorder %v534_v28, 3  ;;  %v561_v15 = vsel %vm553_vm6, %v540_v60, %v543_v62  ;;  %v562_v16 = vsel %vm556_vm9, %v549_v3, 920167782 }
  0xb2   : > { %v565_v18 = vsel %vm553_vm6, %v543_v62, %v546_v0  ;;  %v478_v19 = vadd.s32 536870912, %v477_v5  ;;  %v557_v20 = vsel %vm553_vm6, %v537_v7, %v540_v60  ;;  %v563_v21 = vsel %vm555_vm10, %v546_v0, %v562_v16 }
  0xb3   : > { %v566_v22 = vsel %vm556_vm9, %v552_v8, 1326507024  ;;  %v559_v24 = vsel %vm555_vm10, %v543_v62, %v558_v13  ;;  %v564_v25 = vsel %vm554_vm8, %v561_v15, %v563_v21  ;;  %v3587_v29 = vadd.s32 4294967169, %v733_v4 }
  0xb4   : > { %v567_v26 = vsel %vm555_vm10, %v549_v3, %v566_v22  ;;  %v479_v31 = vshrl.u32 %v478_v19, 30  ;;  %v4298_v33 = vmul.u32.u64.low %v4264_v37, %v564_v25  ;;  %v4299_v34 = vmul.u32.u64.high %v4264_v37, %v564_v25, %v4298_v33 }
  0xb5   : > { %v568_v32 = vsel %vm554_vm8, %v565_v18, %v567_v26  ;;  %v739_v42 = vadd.s32 1, %v3587_v29  ;;  %v560_v44 = vsel %vm554_vm8, %v557_v20, %v559_v24  ;;  %v729_v45 = vand.u32 2147483647, %v4242_v52 }
  0xb6   : > { %v4303_v36 = vmul.u32.u64.low %v4264_v37, %v568_v32  ;;  %v4304_v39 = vmul.u32.u64.high %v4264_v37, %v568_v32, %v4303_v36  ;;  %v480_v43 = vshll.u32 %v479_v31, 30  ;;  %v391_v47 = vmul.f32 %v382_v14, %v4223_v23 }
  0xb7   : > { %vm740_vm11 = vcmp.gt.s32.totalorder %v739_v42, 0  ;;  %v579_v49 = vadd.s32 1, %v4299_v34  ;;  %v576_v53 = vmul.u32 %v4264_v37, %v560_v44  ;;  %v4318_v57 = vand.u32 8388607, %v729_v45 }
  0xb8   : > { %v481_v48 = vsub.s32 %v477_v5, %v480_v43  ;;  %v741_v51 = vsel %vm740_vm11, %v739_v42, 0  ;;  %vm578_vm12 = vc.u32 %v4304_v39, %v4298_v33  ;;  %v4313_v55 = vadd.f32 %v406_v46, %v391_v47 }
  0xb9   : > { %v580_v28 = vsel %vm578_vm12, %v579_v49, %v4299_v34  ;;  %v743_v58 = vand.u32 31, %v741_v51  ;;  %v473_v37 = vadd.s32 %v4271_v41, %v4268_v40  ;;  %v503_v1 = vsub.s32 4, %v479_v31 }
  0xba   : > { %v483_v50 = vsub.s32 0, %v481_v48  ;;  %v581_v60 = vadd.s32 %v580_v28, %v576_v53  ;;  %v4323_v3 = vshrl.u32 %v741_v51, 5  ;;  %v737_v5 = vor.u32 8388608, %v4318_v57 }
  0xbb   : > { %v744_v0 = vsub.s32 32, %v743_v58  ;;  %v625_v7 = vand.u32 2147483647, %v4313_v55  ;;  %v628_v8 = vand.u32 2139095040, %v4313_v55  ;;  %v746_v14 = vshll.u32 %v4112_v54, %v743_v58 }
  0xbc   : > { %v3576_v62 = vmin.u32 %v483_v50, %v481_v48  ;;  %v582_v2 = vadd.s32 536870912, %v581_v60  ;;  %v749_v18 = vshll.u32 %v4113_v56, %v743_v58  ;;  %v504_v21 = vsel %vm419_vm13, %v503_v1, %v479_v31 }
  0xbd   : > { %v747_v15 = vshrl.u32 %v4113_v56, %v744_v0  ;;  %v750_v16 = vshrl.u32 %v4114_v59, %v744_v0  ;;  %v753_v19 = vshrl.u32 %v4115_v61, %v744_v0  ;;  %v756_v20 = vshrl.u32 %v4116_v63, %v744_v0 }
  0xbe   : > { %v485_v4 = vclz %v3576_v62  ;;  %v583_v13 = vshrl.u32 %v582_v2, 30  ;;  %v755_v24 = vshll.u32 %v4115_v61, %v743_v58  ;;  %vm761_vm0 = vcmp.lt.s32.totalorder %v4323_v3, 1 }
  0xbf   : > { %v748_v30 = vor.u32 %v747_v15, %v746_v14  ;;  %v751_v25 = vor.u32 %v750_v16, %v749_v18  ;;  %v752_v26 = vshll.u32 %v4114_v59, %v743_v58  ;;  %v759_v36 = vshrl.u32 %v4117_v6, %v744_v0 }
  0xc0   : > { %v3577_v41 = vadd.s32 4294967294, %v485_v4  ;;  %v584_v22 = vshll.u32 %v583_v13, 30  ;;  %v757_v34 = vor.u32 %v756_v20, %v755_v24  ;;  %vm763_vm2 = vcmp.lt.s32.totalorder %v4323_v3, 3 }
  0xc1   : > { %v754_v44 = vor.u32 %v753_v19, %v752_v26  ;;  %v607_v46 = vsub.s32 4, %v583_v13  ;;  %v745_v47 = vshrl.u32 %v4112_v54, %v744_v0  ;;  %v758_v49 = vshll.u32 %v4116_v63, %v743_v58 }
  0xc2   : > { %vm3578_vm1 = vcmp.lt.s32.totalorder %v3577_v41, 0  ;;  %v4346_v32 = vsub.s32 %v581_v60, %v584_v22  ;;  %vm764_vm3 = vcmp.lt.s32.totalorder %v4323_v3, 4  ;;  %v769_v62 = vsel %vm761_vm0, %v748_v30, %v751_v25 }
  0xc3   : > { %v488_v29 = vsel %vm3578_vm1, 0, %v3577_v41  ;;  %v760_v60 = vor.u32 %v759_v36, %v758_v49  ;;  %v770_v58 = vsel %vm764_vm3, %v757_v34, 920167782  ;;  %v506_v1 = vsel %vm4333_vm14, 0, %v504_v21 }
  0xc4   : > { %v489_v42 = vsub.s32 32, %v488_v29  ;;  %v493_v43 = vsub.s32 4294967266, %v488_v29  ;;  %v587_v31 = vsub.s32 0, %v4346_v32  ;;  %v490_v51 = vshll.u32 %v481_v48, %v488_v29 }
  0xc5   : > { %v771_v38 = vsel %vm763_vm2, %v754_v44, %v770_v58  ;;  %v608_v4 = vsel %vm523_vm15, %v607_v46, %v583_v13  ;;  %vm762_vm5 = vcmp.lt.s32.totalorder %v4323_v3, 2  ;;  %v765_v15 = vsel %vm761_vm0, %v745_v47, %v748_v30 }
  0xc6   : > { %v491_v53 = vshrl.u32 %v473_v37, %v489_v42  ;;  %v494_v50 = vadd.s32 127, %v493_v43  ;;  %v3580_v57 = vmin.u32 %v587_v31, %v4346_v32  ;;  %v766_v37 = vsel %vm764_vm3, %v754_v44, 2102212464 }
  0xc7   : > { %v772_v16 = vsel %vm762_vm5, %v769_v62, %v771_v38  ;;  %v773_v41 = vsel %vm761_vm0, %v751_v25, %v754_v44  ;;  %v767_v19 = vsel %vm763_vm2, %v751_v25, %v766_v37  ;;  %v774_v20 = vsel %vm764_vm3, %v760_v60, 1326507024 }
  0xc8   : > { %v492_v48 = vor.u32 %v491_v53, %v490_v51  ;;  %v495_v0 = vshll.u32 %v494_v50, 23  ;;  %v589_v2 = vclz %v3580_v57  ;;  %v777_v13 = vshll.u32 %v737_v5, 8 }
  0xc9   : > { %v775_v24 = vsel %vm763_vm2, %v757_v34, %v774_v20  ;;  %v629_v30 = vshrl.u32 %v628_v8, 23  ;;  %v577_v5 = vadd.s32 %v4298_v33, %v4304_v39  ;;  %v768_v8 = vsel %vm762_vm5, %v765_v15, %v767_v19 }
  0xca   : > { %v496_v14 = vor.u32 4788187, %v495_v0  ;;  %v3581_v18 = vadd.s32 4294967294, %v589_v2  ;;  %v499_v22 = vcvt.s32.f32 %v492_v48  ;;  %v776_v26 = vsel %vm762_vm5, %v773_v41, %v775_v24 }
  0xcb   : > { %v4388_v29 = vmul.u32.u64.low %v777_v13, %v772_v16  ;;  %v4389_v36 = vmul.u32.u64.high %v777_v13, %v772_v16, %v4388_v29  ;;  %v4392_v43 = vmul.u32.u64.low %v777_v13, %v776_v26  ;;  %v4393_v44 = vmul.u32.u64.high %v777_v13, %v776_v26, %v4392_v43 }
  0xcc   : > { %v497_v21 = vand.u32 2147483647, %v496_v14  ;;  %vm3582_vm6 = vcmp.lt.s32.totalorder %v3581_v18, 0  ;;  %v510_v47 = vadd.s32 3, %v506_v1  ;;  %v610_v49 = vsel %vm4356_vm4, 0, %v608_v4 }
  0xcd   : > { %v592_v25 = vsel %vm3582_vm6, 0, %v3581_v18  ;;  %v3583_v51 = vadd.s32 4294967169, %v629_v30  ;;  %v787_v60 = vadd.s32 1, %v4389_v36  ;;  %v784_v39 = vmul.u32 %v777_v13, %v768_v8 }
  0xce   : > { %v500_v42 = vmul.f32 %v499_v22, %v497_v21  ;;  %v593_v31 = vsub.s32 32, %v592_v25  ;;  %v597_v46 = vsub.s32 4294967266, %v592_v25  ;;  %v594_v53 = vshll.u32 %v4346_v32, %v592_v25 }
  0xcf   : > { %vm786_vm7 = vc.u32 %v4393_v44, %v4388_v29  ;;  %v635_v3 = vadd.s32 1, %v3583_v51  ;;  %v4411_v1 = vand.u32 3, %v510_v47  ;;  %v614_v2 = vadd.s32 3, %v610_v49 }
  0xd0   : > { %v501_v34 = vxor.u32 2147483648, %v500_v42  ;;  %v595_v50 = vshrl.u32 %v577_v5, %v593_v31  ;;  %v598_v57 = vadd.s32 127, %v597_v46  ;;  %v788_v32 = vsel %vm786_vm7, %v787_v60, %v4389_v36 }
  0xd1   : > { %v789_v0 = vadd.s32 %v788_v32, %v784_v39  ;;  %vm636_vm8 = vcmp.gt.s32.totalorder %v635_v3, 0  ;;  %v632_v40 = vand.u32 8388607, %v625_v7  ;;  %vm513_vm9 = vcmp.eq.s32.totalorder %v4411_v1, 0 }
  0xd2   : > { %v502_v33 = vsel %vm419_vm13, %v501_v34, %v500_v42  ;;  %v596_v58 = vor.u32 %v595_v50, %v594_v53  ;;  %v599_v48 = vshll.u32 %v598_v57, 23  ;;  %v637_v38 = vsel %vm636_vm8, %v635_v3, 0 }
  0xd3   : > { %v505_v62 = vsel %vm4333_vm14, %v4226_v27, %v502_v33  ;;  %v790_v4 = vadd.s32 536870912, %v789_v0  ;;  %v639_v14 = vand.u32 31, %v637_v38  ;;  %v4418_v20 = vand.u32 3, %v614_v2 }
  0xd4   : > { %4071 = vcosq.f32 %v505_v62  ;;  %v600_v37 = vor.u32 4788187, %v599_v48  ;;  %v603_v16 = vcvt.s32.f32 %v596_v58  ;;  %v633_v22 = vor.u32 8388608, %v632_v40 }
  0xd5   : > { %4073 = vsinq.f32 %v505_v62  ;;  %v4415_v41 = vshrl.u32 %v790_v4, 30  ;;  %v640_v18 = vsub.s32 32, %v639_v14  ;;  %v4421_v24 = vshrl.u32 %v637_v38, 5 }
  0xd6   : > { %v601_v15 = vand.u32 2147483647, %v600_v37  ;;  %v642_v36 = vshll.u32 %v4112_v54, %v639_v14  ;;  %v645_v42 = vshll.u32 %v4113_v56, %v639_v14  ;;  %vm512_vm10 = vcmp.lt.s32.totalorder %v4411_v1, 2 }
  0xd7   : > { %v792_v13 = vshll.u32 %v4415_v41, 30  ;;  %v643_v30 = vshrl.u32 %v4113_v56, %v640_v18  ;;  %v646_v25 = vshrl.u32 %v4114_v59, %v640_v18  ;;  %v648_v5 = vshll.u32 %v4114_v59, %v639_v14 }
  0xd8   : > { %v604_v19 = vmul.f32 %v603_v16, %v601_v15  ;;  %v649_v31 = vshrl.u32 %v4115_v61, %v640_v18  ;;  %v652_v46 = vshrl.u32 %v4116_v63, %v640_v18  ;;  %v651_v47 = vshll.u32 %v4115_v61, %v639_v14 }
  0xd9   : > { %v4424_v26 = vsub.s32 %v789_v0, %v792_v13  ;;  %v655_v49 = vshrl.u32 %v4117_v6, %v640_v18  ;;  %v644_v50 = vor.u32 %v643_v30, %v642_v36  ;;  %v654_v59 = vshll.u32 %v4116_v63, %v639_v14 }
  0xda   : > { %v605_v21 = vxor.u32 2147483648, %v604_v19  ;;  %v647_v33 = vor.u32 %v646_v25, %v645_v42  ;;  %vm516_vm11 = vcmp.eq.s32.totalorder %v4411_v1, 2  ;;  %v785_v28 = vadd.s32 %v4388_v29, %v4393_v44  ;;  %v1257_v42 = vld [vmem:[%s4471_s7] sm:$0xff] }
  0xdb   : > { %v795_v56 = vsub.s32 0, %v4424_v26  ;;  %v650_v39 = vor.u32 %v649_v31, %v648_v5  ;;  %v653_v61 = vor.u32 %v652_v46, %v651_v47  ;;  %vm509_vm12 = vweird.f32 %v4226_v27 }
  0xdc   : > { %v606_v43 = vsel %vm523_vm15, %v605_v21, %v604_v19  ;;  %v656_v3 = vor.u32 %v655_v49, %v654_v59  ;;  %v4447_v62 = vshll.u32 %v633_v22, 8  ;;  %vm1290_vm13 = vcmask 261120  }
  0xdd   : > { %v609_v34 = vsel %vm4356_vm4, %v4233_v35, %v606_v43  ;;  %v3588_v60 = vmin.u32 %v795_v56, %v4424_v26  ;;  %v641_v48 = vshrl.u32 %v4112_v54, %v640_v18  ;;  %vm657_vm14 = vcmp.lt.s32.totalorder %v4421_v24, 1 }
  0xde   : > { %v4072_v8 = vpop.eup %4071  ;;  %4075 = vcosq.f32 %v609_v34  ;;  %vm617_vm15 = vcmp.eq.s32.totalorder %v4418_v20, 0  ;;  %vm658_vm0 = vcmp.lt.s32.totalorder %v4421_v24, 2  ;;  %vm660_vm1 = vcmp.lt.s32.totalorder %v4421_v24, 4 }
  0xdf   : > { %v4074_v51 = vpop.eup %4073  ;;  %v517_v53 = vxor.u32 2147483648, %v4072_v8  ;;  %4077 = vsinq.f32 %v609_v34  ;;  %v797_v6 = vclz %v3588_v60  ;;  %v665_v44 = vsel %vm657_vm14, %v644_v50, %v647_v33 }
  0xe0   : > { %v514_v57 = vxor.u32 2147483648, %v4074_v51  ;;  %vm616_vm2 = vcmp.lt.s32.totalorder %v4418_v20, 2  ;;  %vm659_vm3 = vcmp.lt.s32.totalorder %v4421_v24, 3  ;;  %v662_v32 = vsel %vm660_vm1, %v650_v39, 2102212464 }
  0xe1   : > { %v518_v58 = vsel %vm516_vm11, %v517_v53, %v4074_v51  ;;  %v3589_v29 = vadd.s32 4294967294, %v797_v6  ;;  %v666_v54 = vsel %vm660_vm1, %v653_v61, 920167782  ;;  %v669_v0 = vsel %vm657_vm14, %v647_v33, %v650_v39 }
  0xe2   : > { %v515_v63 = vsel %vm513_vm9, %v4072_v8, %v514_v57  ;;  %vm613_vm4 = vweird.f32 %v4233_v35  ;;  %v667_v38 = vsel %vm659_vm3, %v650_v39, %v666_v54  ;;  %v670_v2 = vsel %vm660_vm1, %v656_v3, 1326507024  ;;  %v1945_v8 = vld [vmem:[%s4483_s10] sm:$0xff] }
  0xe3   : > { %v519_v37 = vsel %vm512_vm10, %v515_v63, %v518_v58  ;;  %vm3590_vm5 = vcmp.lt.s32.totalorder %v3589_v29, 0  ;;  %v661_v14 = vsel %vm657_vm14, %v641_v48, %v644_v50  ;;  %v668_v1 = vsel %vm658_vm0, %v665_v44, %v667_v38 }
  0xe4   : > { %v800_v4 = vsel %vm3590_vm5, 0, %v3589_v29  ;;  %v671_v15 = vsel %vm659_vm3, %v653_v61, %v670_v2  ;;  %v663_v18 = vsel %vm659_vm3, %v647_v33, %v662_v32  ;;  %v4503_v34 = vsel %vm509_vm12, nan, %v519_v37 }
  0xe5   : > { %v801_v16 = vsub.s32 32, %v800_v4  ;;  %v805_v40 = vsub.s32 4294967266, %v800_v4  ;;  %v672_v19 = vsel %vm658_vm0, %v669_v0, %v671_v15  ;;  %v802_v5 = vshll.u32 %v4424_v26, %v800_v4 }
  0xe6   : > { %v4490_v21 = vmul.u32.u64.low %v4447_v62, %v672_v19  ;;  %v4491_v22 = vmul.u32.u64.high %v4447_v62, %v672_v19, %v4490_v21  ;;  %v4494_v30 = vmul.u32.u64.low %v4447_v62, %v668_v1  ;;  %v4495_v36 = vmul.u32.u64.high %v4447_v62, %v668_v1, %v4494_v30 }
  0xe7   : > { %v803_v31 = vshrl.u32 %v785_v28, %v801_v16  ;;  %v806_v46 = vadd.s32 127, %v805_v40  ;;  %vm620_vm6 = vcmp.eq.s32.totalorder %v4418_v20, 2  ;;  %v664_v47 = vsel %vm658_vm0, %v661_v14, %v663_v18 }
  0xe8   : > { %v4076_v13 = vpop.eup %4075  ;;  %v1292_v50 = vsel %vm1290_vm13, %v1257_v42, 0  ;;  %vm682_vm7 = vc.u32 %v4491_v22, %v4494_v30  ;;  %v683_v27 = vadd.s32 1, %v4495_v36  ;;  %v1971_v59 = vsel %vm1290_vm13, %v1945_v8, 0 }
  0xe9   : > { %v4078_v25 = vpop.eup %4077  ;;  %v621_v43 = vxor.u32 2147483648, %v4076_v13  ;;  %v804_v51 = vor.u32 %v803_v31, %v802_v5  ;;  %v807_v53 = vshll.u32 %v806_v46, 23  ;;  %v1304_v57 = vand.u32 4294901760, %v4503_v34 }
  0xea   : > { %v618_v56 = vxor.u32 2147483648, %v4078_v25  ;;  %v680_v33 = vmul.u32 %v4447_v62, %v664_v47  ;;  %v684_v61 = vsel %vm682_vm7, %v683_v27, %v4495_v36  ;;  %v4524_v6 = vand.u32 4294901760, %v1292_v50 }
  0xeb   : > { %v622_v49 = vsel %vm620_vm6, %v621_v43, %v4078_v25  ;;  %v808_v60 = vor.u32 4788187, %v807_v53  ;;  %v811_v39 = vcvt.s32.f32 %v804_v51  ;;  %v4527_v48 = vand.u32 4294901760, %v1971_v59 }
  0xec   : > { %v619_v26 = vsel %vm617_vm15, %v4076_v13, %v618_v56  ;;  %v685_v58 = vadd.s32 %v684_v61, %v680_v33  ;;  %v4530_v20 = vsub.f32 %v1292_v50, %v4524_v6  ;;  %vm731_vm8 = vcmp.lt.s32.totalorder %v4242_v52, 0 }
  0xed   : > { %v623_v24 = vsel %vm616_vm2, %v619_v26, %v622_v49  ;;  %v809_v63 = vand.u32 2147483647, %v808_v60  ;;  %v4540_v32 = vsub.f32 %v1971_v59, %v4527_v48  ;;  %vm4561_vm9 = vcmp.le.f32.partialorder %v729_v45, 0.7853982 }
  0xee   : > { %v4521_v28 = vsel %vm613_vm4, nan, %v623_v24  ;;  %v686_v29 = vadd.s32 536870912, %v685_v58  ;;  %v1374_v44 = vand.u32 4294901760, %v4530_v20  ;;  %v815_v36 = vsub.s32 4, %v4415_v41 }
  0xef   : > { %v1307_v3 = vand.u32 4294901760, %v4521_v28  ;;  %v812_v62 = vmul.f32 %v811_v39, %v809_v63  ;;  %v2053_v37 = vand.u32 4294901760, %v4540_v32  ;;  %v4118_v25 = vmov 1  }
  0xf0   : > { %v4542_v54 = vshrl.u32 %v686_v29, 30  ;;  %v1375_v0 = vsub.f32 %v4530_v20, %v1374_v44  ;;  %4070 = vset.pattern.permute.xlu1 %v4118_v25  ;;  %4069 = vset.pattern.permute.xlu0 %v4118_v25  ;;  %v816_v45 = vsel %vm731_vm8, %v815_v36, %v4415_v41  ;;  %v681_v5 = vadd.s32 %v4494_v30, %v4491_v22  ;;  %v1946_v29 = vld [vmem:[%s4483_s10 + $0x8] sm:$0xff] }
  0xf1   : > { %v4536_v35 = vpack.c.bf16 %v1307_v3, %v1304_v57  ;;  %v813_v38 = vxor.u32 2147483648, %v812_v62  ;;  %v2054_v14 = vsub.f32 %v4540_v32, %v2053_v37  ;;  %1955 = vperm.xlu1 %4070, %v4206_v9   ;;  %1951 = vperm.xlu0 %4069, %v4208_v10   ;;  %v818_v8 = vsel %vm4561_vm9, 0, %v816_v45 }
  0xf2   : > { %v688_v2 = vshll.u32 %v4542_v54, 30  ;;  %v1376_v4 = vand.u32 4294901760, %v1375_v0  ;;  %v822_v51 = vadd.s32 3, %v818_v8  ;;  %v711_v60 = vsub.s32 4, %v4542_v54 }
  0xf3   : > { %3875 = vmatprep.subr.bf16.mxu0 %v4536_v35  ;;  %3923 = vmatprep.subr.bf16.mxu1 %v4536_v35  ;;  %v2055_v15 = vand.u32 4294901760, %v2054_v14  ;;  %v814_v16 = vsel %vm731_vm8, %v813_v38, %v812_v62  ;;  %vm4583_vm14 = vcmp.le.f32.partialorder %v625_v7, 0.7853982  ;;  %vm627_vm15 = vcmp.lt.s32.totalorder %v4313_v55, 0  ;;  %v1259_v38 = vld [vmem:[%s4471_s7 + $0x10] sm:$0xff] }
  0xf4   : > { %3877 = vmatpush3.bf16.msra.mxu0 %v4536_v35  ;;  %3925 = vmatpush3.bf16.msra.mxu1 %v4536_v35  ;;  %v689_v1 = vsub.s32 %v685_v58, %v688_v2  ;;  %v817_v13 = vsel %vm4561_vm9, %v4242_v52, %v814_v16  ;;  %v823_v26 = vand.u32 3, %v822_v51  ;;  %v712_v58 = vsel %vm627_vm15, %v711_v60, %v4542_v54 }
  0xf5   : > { %3714 = vmatprep.mubr.f32.mxu0 %v1376_v4  ;;  %3798 = vmatprep.mubr.f32.mxu1 %v2055_v15  ;;  %4079 = vcosq.f32 %v817_v13  ;;  %v4597_v7 = vsub.f32 %v4521_v28, %v1307_v3  ;;  %v714_v54 = vsel %vm4583_vm14, 0, %v712_v58  ;;  %v1947_v4 = vld [vmem:[%s4483_s10 + $0x10] sm:$0xff]  ;;  %v1974_v14 = vsel %vm1290_vm13, %v1946_v29, 0  ;;  %v1260_v15 = vld [vmem:[%s4471_s7 + $0x18] sm:$0xff] }
  0xf6   : > { %v691_v40 = vsub.s32 0, %v689_v1  ;;  %4081 = vsinq.f32 %v817_v13  ;;  %1959 = vperm.xlu1 %4070, %v4214_v12   ;;  %1963 = vperm.xlu0 %4069, %v4212_v11   ;;  %vm825_vm11 = vcmp.eq.s32.totalorder %v823_v26, 0  ;;  %vm828_vm12 = vcmp.eq.s32.totalorder %v823_v26, 2  ;;  %v1258_v12 = vld [vmem:[%s4471_s7 + $0x8] sm:$0xff]  ;;  %v1948_v13 = vld [vmem:[%s4483_s10 + $0x18] sm:$0xff] }
  0xf7   : > { %vm824_vm0 = vcmp.lt.s32.totalorder %v823_v26, 2  ;;  %v1295_v0 = vsel %vm1290_vm13, %v1258_v12, 0  ;;  %vm821_vm1 = vweird.f32 %v4242_v52  ;;  %v1298_v3 = vsel %vm1290_vm13, %v1259_v38, 0 }
  0xf8   : > { %v3584_v19 = vmin.u32 %v691_v40, %v689_v1  ;;  %v4611_v28 = vand.u32 4294901760, %v1295_v0  ;;  %v718_v40 = vadd.s32 3, %v714_v54  ;;  %v1422_v18 = vand.u32 4294901760, %v4597_v7 }
  0xf9   : > { %v4620_v52 = vand.u32 4294901760, %v1298_v3  ;;  %v1301_v36 = vsel %vm1290_vm13, %v1260_v15, 0  ;;  %v1980_v25 = vsel %vm1290_vm13, %v1948_v13, 0  ;;  %vm717_vm4 = vweird.f32 %v4313_v55 }
  0xfa   : > { %v693_v21 = vclz %v3584_v19  ;;  %v1977_v19 = vsel %vm1290_vm13, %v1947_v4, 0  ;;  %v719_v45 = vand.u32 3, %v718_v40  ;;  %vm3372_vm5 = vcmask 130048  }
  0xfc   : > { %v3585_v42 = vadd.s32 4294967294, %v693_v21  ;;  %v4618_v21 = vand.u32 4294901760, %v1974_v14  ;;  %vm724_vm13 = vcmp.eq.s32.totalorder %v719_v45, 2  ;;  %vm721_vm2 = vcmp.eq.s32.totalorder %v719_v45, 0 }
  0xfd   : > { %vm720_vm3 = vcmp.lt.s32.totalorder %v719_v45, 2 }
  0xfe   : > { %vm3586_vm10 = vcmp.lt.s32.totalorder %v3585_v42, 0 }
  0xff   : > { %v696_v43 = vsel %vm3586_vm10, 0, %v3585_v42  ;;  %v4080_v41 = vpop.eup %4079  ;;  %v4624_v42 = vand.u32 4294901760, %v1977_v19 }
 0x100   : > { %v697_v31 = vsub.s32 32, %v696_v43  ;;  %v701_v46 = vsub.s32 4294967266, %v696_v43  ;;  %v698_v56 = vshll.u32 %v689_v1, %v696_v43  ;;  %v4082_v50 = vpop.eup %4081  ;;  %v829_v59 = vxor.u32 2147483648, %v4080_v41 }
 0x101   : > { %v826_v27 = vxor.u32 2147483648, %v4082_v50  ;;  %v4609_v1 = vsub.f32 %v4503_v34, %v1304_v57  ;;  %v1423_v43 = vsub.f32 %v4597_v7, %v1422_v18 }
 0x102   : > { %v699_v47 = vshrl.u32 %v681_v5, %v697_v31  ;;  %v702_v49 = vadd.s32 127, %v701_v46  ;;  %v830_v61 = vsel %vm828_vm12, %v829_v59, %v4082_v50  ;;  %v4631_v5 = vsub.f32 %v1295_v0, %v4611_v28 }
 0x103   : > { %v827_v39 = vsel %vm825_vm11, %v4080_v41, %v826_v27  ;;  %v1415_v57 = vand.u32 4294901760, %v4609_v1  ;;  %v4634_v31 = vsub.f32 %v1974_v14, %v4618_v21  ;;  %v4636_v46 = vand.u32 4294901760, %v1301_v36 }
 0x104   : > { %v700_v9 = vor.u32 %v699_v47, %v698_v56  ;;  %v703_v10 = vshll.u32 %v702_v49, 23  ;;  %v831_v2 = vsel %vm824_vm0, %v827_v39, %v830_v61  ;;  %v4639_v56 = vsub.f32 %v1298_v3, %v4620_v52 }
 0x105   : > { %v832_v16 = vsel %vm821_vm1, nan, %v831_v2  ;;  %v4641_v47 = vand.u32 4294901760, %v1980_v25  ;;  %v4649_v41 = vsub.f32 %v1977_v19, %v4624_v42  ;;  %v1424_v50 = vand.u32 4294901760, %v1423_v43 }
 0x106   : > { %v704_v53 = vor.u32 4788187, %v703_v10  ;;  %v707_v30 = vcvt.s32.f32 %v700_v9  ;;  %v1313_v34 = vand.u32 4294901760, %v832_v16  ;;  %v1416_v10 = vsub.f32 %v4609_v1, %v1415_v57 }
 0x107   : > { %v2063_v26 = vand.u32 4294901760, %v4634_v31  ;;  %v4654_v27 = vsub.f32 %v1301_v36, %v4636_v46  ;;  %v4658_v60 = vsub.f32 %v1980_v25, %v4641_v47  ;;  %v2073_v12 = vand.u32 4294901760, %v4649_v41 }
 0x108   : > { %v705_v22 = vand.u32 2147483647, %v704_v53  ;;  %v4646_v51 = vsub.f32 %v832_v16, %v1313_v34  ;;  %v1417_v61 = vand.u32 4294901760, %v1416_v10 }
 0x109   : > { %v1404_v29 = vand.u32 4294901760, %v4654_v27  ;;  %v2083_v38 = vand.u32 4294901760, %v4658_v60  ;;  %v2074_v14 = vsub.f32 %v4649_v41, %v2073_v12 }
 0x10a   : > { %v708_v24 = vmul.f32 %v707_v30, %v705_v22  ;;  %v1384_v22 = vand.u32 4294901760, %v4631_v5  ;;  %v1436_v11 = vand.u32 4294901760, %v4646_v51  ;;  %v3882_v0 = vpack.c.bf16 %v1424_v50, %v1417_v61 }
 0x10b   : > { %v1405_v16 = vsub.f32 %v4654_v27, %v1404_v29  ;;  %v2084_v25 = vsub.f32 %v4658_v60, %v2083_v38 }
 0x10c   : > { %v709_v33 = vxor.u32 2147483648, %v708_v24  ;;  %v1385_v58 = vsub.f32 %v4631_v5, %v1384_v22  ;;  %v1437_v4 = vsub.f32 %v4646_v51, %v1436_v11 }
 0x10d   : > { %v1406_v45 = vand.u32 4294901760, %v1405_v16 }
 0x10e   : > { %v710_v63 = vsel %vm627_vm15, %v709_v33, %v708_v24  ;;  %v1394_v24 = vand.u32 4294901760, %v4639_v56  ;;  %v1386_v3 = vand.u32 4294901760, %v1385_v58  ;;  %v1438_v36 = vand.u32 4294901760, %v1437_v4 }
 0x10f   : > { %v713_v62 = vsel %vm4583_vm14, %v4313_v55, %v710_v63 }
 0x110   : > { %4083 = vcosq.f32 %v713_v62  ;;  %v1395_v55 = vsub.f32 %v4639_v56, %v1394_v24 }
 0x111   : > { %4085 = vsinq.f32 %v713_v62  ;;  %v2064_v62 = vsub.f32 %v4634_v31, %v2063_v26 }
 0x112   : > { %v1396_v19 = vand.u32 4294901760, %v1395_v55 }
 0x113   : > { %v2065_v15 = vand.u32 4294901760, %v2064_v62 }
 0x11a   : > { %v4084_v8 = vpop.eup %4083 }
 0x11b   : > { %v4086_v49 = vpop.eup %4085  ;;  %v725_v9 = vxor.u32 2147483648, %v4084_v8 }
 0x11c   : > { %v722_v53 = vxor.u32 2147483648, %v4086_v49 }
 0x11d   : > { %v726_v30 = vsel %vm724_vm13, %v725_v9, %v4086_v49  ;;  %v2085_v49 = vand.u32 4294901760, %v2084_v25  ;;  %v3890_v9 = vpack.c.bf16 %v4597_v7, %v4609_v1 }
 0x11e   : > { %v723_v59 = vsel %vm721_vm2, %v4084_v8, %v722_v53  ;;  %v3906_v53 = vpack.c.bf16 %v1422_v18, %v1415_v57  ;;  %v4119_v18 = vmov 1966171168   ;;  %v2597_v57 = vshrl.u32 %v348_v17, 7 }
 0x11f   : > { %v727_v33 = vsel %vm720_vm3, %v723_v59, %v726_v30 }
 0x120   : > { %v728_v39 = vsel %vm717_vm4, nan, %v727_v33  ;;  %v4784_v33 = vsub.s32 3, %v2597_v57  ;;  %v4789_v58 = vsub.s32 5, %v2597_v57  ;;  %v4791_v62 = vsub.s32 6, %v2597_v57 }
 0x121   : > { %v1310_v63 = vand.u32 4294901760, %v728_v39  ;;  %v4793_v55 = vsub.s32 7, %v2597_v57 }
 0x123   : > { %v4674_v2 = vpack.c.bf16 %v1313_v34, %v1310_v63  ;;  %v4676_v54 = vsub.f32 %v728_v39, %v1310_v63  ;;  %v2075_v34 = vand.u32 4294901760, %v2074_v14 }
 0x125   : > { %3879 = vmatprep.subr.bf16.mxu0 %v4674_v2  ;;  %3927 = vmatprep.subr.bf16.mxu1 %v4674_v2  ;;  %v1429_v40 = vand.u32 4294901760, %v4676_v54  ;;  %v3894_v10 = vpack.c.bf16 %v4646_v51, %v4676_v54 }
 0x126   : > { %3881 = vmatpush3.bf16.msra.mxu0 %v4674_v2  ;;  %3929 = vmatpush3.bf16.msra.mxu1 %v4674_v2 }
 0x127   : > { %3883 = vmatprep.subr.bf16.mxu0 %v3882_v0  ;;  %3931 = vmatprep.subr.bf16.mxu1 %v3882_v0  ;;  %v1430_v13 = vsub.f32 %v4676_v54, %v1429_v40  ;;  %v3910_v7 = vpack.c.bf16 %v1436_v11, %v1429_v40  ;;  %v4786_v11 = vsub.s32 4, %v2597_v57 }
 0x129   : > { %3715 = vmatmul.mubr.f32.vlgmr.msra.gmra.mrb[0].mxu0 %v1386_v3  ;;  %3799 = vmatmul.mubr.f32.vlgmr.msra.gmra.mrb[0].mxu1 %v2065_v15  ;;  %v1431_v43 = vand.u32 4294901760, %v1430_v13 }
 0x12a   : > { %3885 = vmatpush3.bf16.msra.mxu0 %v3882_v0  ;;  %3933 = vmatpush3.bf16.msra.mxu1 %v3882_v0 }
 0x12b   : > { %3717 = vmatprep.mubr.f32.mxu0 %v1396_v19  ;;  %v3886_v8 = vpack.c.bf16 %v1438_v36, %v1431_v43  ;;  %3801 = vmatprep.mubr.f32.mxu1 %v2075_v34 }
 0x12d   : > { %3718 = vmatmul.mubr.f32.gmra.mrb[2].mxu0 %v1406_v45  ;;  %3887 = vmatprep.subr.bf16.mxu0 %v3886_v8 }
 0x12e   : > { %3935 = vmatprep.subr.bf16.mxu1 %v3886_v8  ;;  %3889 = vmatpush3.bf16.msra.mxu0 %v3886_v8 }
 0x12f   : > { %3802 = vmatmul.mubr.f32.gmra.mrb[2].mxu1 %v2085_v49  ;;  %3891 = vmatprep.subr.bf16.mxu0 %v3890_v9 }
 0x130   : > { %3937 = vmatpush3.bf16.msra.mxu1 %v3886_v8  ;;  %3728 = vmatprep.mubr.f32.mxu0 %v4524_v6 }
 0x131   : > { %3939 = vmatprep.subr.bf16.mxu1 %v3890_v9  ;;  %3729 = vmatmul.mubr.f32.vlgmr.msra.gmra.mrb[0].mxu0 %v4611_v28 }
 0x132   : > { %3812 = vmatprep.mubr.f32.mxu1 %v4527_v48  ;;  %3893 = vmatpush3.bf16.msra.mxu0 %v3890_v9 }
 0x133   : > { %3813 = vmatmul.mubr.f32.vlgmr.msra.gmra.mrb[0].mxu1 %v4618_v21  ;;  %3895 = vmatprep.subr.bf16.mxu0 %v3894_v10 }
 0x134   : > { %3941 = vmatpush3.bf16.msra.mxu1 %v3890_v9  ;;  %3731 = vmatprep.mubr.f32.mxu0 %v4620_v52 }
 0x135   : > { %3943 = vmatprep.subr.bf16.mxu1 %v3894_v10  ;;  %3732 = vmatmul.mubr.f32.gmra.mrb[2].mxu0 %v4636_v46 }
 0x136   : > { %3815 = vmatprep.mubr.f32.mxu1 %v4624_v42  ;;  %3897 = vmatpush3.bf16.msra.mxu0 %v3894_v10 }
 0x137   : > { %3816 = vmatmul.mubr.f32.gmra.mrb[2].mxu1 %v4641_v47  ;;  %3899 = vmatprep.subr.bf16.mxu0 %v4536_v35 }
 0x138   : > { %3945 = vmatpush3.bf16.msra.mxu1 %v3894_v10  ;;  %3742 = vmatprep.mubr.f32.mxu0 %v4530_v20  ;;  %v1269_v20 = vpop.permute.xlu0 %1268 }
 0x139   : > { %3947 = vmatprep.subr.bf16.mxu1 %v4536_v35  ;;  %3743 = vmatmul.mubr.f32.vlgmr.msra.gmra.mrb[0].mxu0 %v4631_v5 }
 0x13a   : > { %3826 = vmatprep.mubr.f32.mxu1 %v4540_v32  ;;  %3901 = vmatpush3.bf16.msra.mxu0 %v4536_v35 }
 0x13b   : > { %3827 = vmatmul.mubr.f32.vlgmr.msra.gmra.mrb[0].mxu1 %v4634_v31  ;;  %3903 = vmatprep.subr.bf16.mxu0 %v4674_v2 }
 0x13c   : > { %3949 = vmatpush3.bf16.msra.mxu1 %v4536_v35  ;;  %3745 = vmatprep.mubr.f32.mxu0 %v4639_v56  ;;  %v4776_v56 = vsub.s32 0, %v2597_v57 }
 0x13d   : > { %3951 = vmatprep.subr.bf16.mxu1 %v4674_v2  ;;  %3746 = vmatmul.mubr.f32.gmra.mrb[2].mxu0 %v4654_v27  ;;  %v4780_v27 = vsub.s32 1, %v2597_v57 }
 0x13e   : > { %3829 = vmatprep.mubr.f32.mxu1 %v4649_v41  ;;  %3905 = vmatpush3.bf16.msra.mxu0 %v4674_v2 }
 0x13f   : > { %3830 = vmatmul.mubr.f32.gmra.mrb[2].mxu1 %v4658_v60  ;;  %3907 = vmatprep.subr.bf16.mxu0 %v3906_v53  ;;  %v4782_v60 = vsub.s32 2, %v2597_v57 }
 0x140   : > { %3953 = vmatpush3.bf16.msra.mxu1 %v4674_v2  ;;  %3756 = vmatprep.mubr.f32.mxu0 %v1374_v44  ;;  %v1279_v44 = vpop.permute.xlu0 %1278 }
 0x141   : > { %3955 = vmatprep.subr.bf16.mxu1 %v3906_v53  ;;  %3757 = vmatmul.mubr.f32.vlgmr.msra.gmra.mrb[0].mxu0 %v1384_v22 }
 0x142   : > { %3840 = vmatprep.mubr.f32.mxu1 %v2053_v37  ;;  %3909 = vmatpush3.bf16.msra.mxu0 %v3906_v53 }
 0x143   : > { %3841 = vmatmul.mubr.f32.vlgmr.msra.gmra.mrb[0].mxu1 %v2063_v26  ;;  %3911 = vmatprep.subr.bf16.mxu0 %v3910_v7 }
 0x144   : > { %3957 = vmatpush3.bf16.msra.mxu1 %v3906_v53  ;;  %3759 = vmatprep.mubr.f32.mxu0 %v1394_v24  ;;  %v1924_v37 = vpop.permute.xlu0 %1923 }
 0x145   : > { %3959 = vmatprep.subr.bf16.mxu1 %v3910_v7  ;;  %3760 = vmatmul.mubr.f32.gmra.mrb[2].mxu0 %v1404_v29 }
 0x146   : > { %3843 = vmatprep.mubr.f32.mxu1 %v2073_v12  ;;  %3913 = vmatpush3.bf16.msra.mxu0 %v3910_v7 }
 0x147   : > { %3844 = vmatmul.mubr.f32.gmra.mrb[2].mxu1 %v2083_v38  ;;  %3915 = vmatprep.subr.bf16.mxu0 %v4536_v35 }
 0x148   : > { %3961 = vmatpush3.bf16.msra.mxu1 %v3910_v7  ;;  %3770 = vmatprep.mubr.f32.mxu0 %v4524_v6 }
 0x149   : > { %3963 = vmatprep.subr.bf16.mxu1 %v4536_v35  ;;  %3771 = vmatmul.mubr.f32.vlgmr.msra.gmra.mrb[0].mxu0 %v4611_v28 }
 0x14a   : > { %3854 = vmatprep.mubr.f32.mxu1 %v4527_v48  ;;  %3917 = vmatpush3.bf16.msra.mxu0 %v4536_v35 }
 0x14b   : > { %3855 = vmatmul.mubr.f32.vlgmr.msra.gmra.mrb[0].mxu1 %v4618_v21  ;;  %3919 = vmatprep.subr.bf16.mxu0 %v4674_v2 }
 0x14c   : > { %3965 = vmatpush3.bf16.msra.mxu1 %v4536_v35  ;;  %3773 = vmatprep.mubr.f32.mxu0 %v4620_v52 }
 0x14d   : > { %3967 = vmatprep.subr.bf16.mxu1 %v4674_v2  ;;  %3774 = vmatmul.mubr.f32.gmra.mrb[2].mxu0 %v4636_v46 }
 0x14e   : > { %3921 = vmatpush3.bf16.msra.mxu0 %v4674_v2  ;;  %3784 = vmatprep.mubr.f32.mxu0 %v4524_v6  ;;  %v1274_v6 = vpop.permute.xlu1 %1273 }
 0x14f   : > { %3857 = vmatprep.mubr.f32.mxu1 %v4624_v42 }
 0x150   : > { %3969 = vmatpush3.bf16.msra.mxu1 %v4674_v2 }
 0x151   : > { %3785 = vmatmul.mubr.f32.vlgmr.msra.gmra.mrb[0].mxu0 %v4611_v28  ;;  %3858 = vmatmul.mubr.f32.gmra.mrb[2].mxu1 %v4641_v47  ;;  %v1934_v28 = vpop.permute.xlu0 %1933 }
 0x152   : > { %3787 = vmatprep.mubr.f32.mxu0 %v4620_v52  ;;  %3868 = vmatprep.mubr.f32.mxu1 %v4527_v48  ;;  %v1284_v35 = vpop.permute.xlu1 %1283  ;;  %v2954_v52 = vunpack.c.l.s4 %v4119_v18  ;;  %v1265_v48 = vmul.f32 0.009947184, %v4223_v23 }
 0x154   : > { %v2955_v31 = vunpack.c.0.s8 %v2954_v52  ;;  %v1286_v50 = vmul.f32 %v1269_v20, %v1265_v48  ;;  %v1289_v22 = vmul.f32 %v1284_v35, %v1265_v48  ;;  %v1288_v30 = vmul.f32 %v1279_v44, %v1265_v48 }
 0x155   : > { %3788 = vmatmul.mubr.f32.gmra.mrb[2].mxu0 %v4636_v46  ;;  %3869 = vmatmul.mubr.f32.vlgmr.msra.gmra.mrb[0].mxu1 %v4618_v21 }
 0x156   : > { %3871 = vmatprep.mubr.f32.mxu1 %v4624_v42  ;;  %v1929_v32 = vpop.permute.xlu1 %1928  ;;  %v1287_v42 = vmul.f32 %v1274_v6, %v1265_v48  ;;  %v4778_v41 = vsub.s32 %v2955_v31, %v2597_v57 }
 0x159   : > { %3872 = vmatmul.mubr.f32.gmra.mrb[2].mxu1 %v4641_v47 }
 0x15a   : > { %v1939_v1 = vpop.permute.xlu1 %1938 }
 0x170   : > { %v1956_v5 = vpop.permute.xlu1 %1955  ;;  %v1952_v21 = vpop.permute.xlu0 %1951 }
 0x171   : > { %v1967_v38 = vmul.f32 %v1956_v5, %v1265_v48  ;;  %v1966_v2 = vmul.f32 %v1952_v21, %v1265_v48 }
 0x175   : > { %v1960_v23 = vpop.permute.xlu1 %1959  ;;  %v1964_v59 = vpop.permute.xlu0 %1963 }
 0x176   : > { %v1968_v4 = vmul.f32 %v1960_v23, %v1265_v48  ;;  %v1969_v14 = vmul.f32 %v1964_v59, %v1265_v48 }
 0x224   : > { %v3786_v46 = vpop.f32.mrb[0].mxu0 }
 0x225   : > { %v3970_v47 = vadd.f32 %v3786_v46, %v1287_v42  ;;  %v1895_v51 = vpop.f32.mrb[1].mxu0 }
 0x226   : > { %v3971_v17 = vadd.f32 %v1895_v51, %v1286_v50 }
 0x227   : > { %v1942_v26 = vadd.f32 %v3970_v47, %v1929_v32 }
 0x228   : > { %v3789_v24 = vpop.f32.mrb[2].mxu0  ;;  %v3870_v12 = vpop.f32.mrb[0].mxu1  ;;  %v4795_v3 = vadd.f32 %v3971_v17, %v1924_v37 }
 0x229   : > { %v3972_v39 = vadd.f32 %v3789_v24, %v1289_v22  ;;  %v1907_v61 = vpop.f32.mrb[3].mxu0  ;;  %v2687_v63 = vrot.slane %v1942_v26, %v4776_v56  ;;  %v2574_v29 = vpop.f32.mrb[1].mxu1  ;;  %v2698_v16 = vrot.slane %v1942_v26, %v4780_v27  ;;  %v2709_v40 = vrot.slane %v1942_v26, %v4782_v60 }
 0x22a   : > { %v3973_v0 = vadd.f32 %v1907_v61, %v1288_v30  ;;  %v2720_v13 = vrot.slane %v1942_v26, %v4784_v33  ;;  %v2731_v36 = vrot.slane %v1942_v26, %v4786_v11  ;;  %v4802_v34 = vrot.slane %v1942_v26, %v4789_v58 }
 0x22b   : > { %v1944_v54 = vadd.f32 %v3972_v39, %v1939_v1  ;;  %2693 = vbcast.lane.b32.xlu0 %v2687_v63, 264  ;;  %2689 = vbcast.lane.b32.xlu1 %v2687_v63, 256  ;;  %v4805_v25 = vrot.slane %v1942_v26, %v4791_v62  ;;  %v4808_v43 = vrot.slane %v1942_v26, %v4793_v55 }
 0x22c   : > { %v1943_v15 = vadd.f32 %v3973_v0, %v1934_v28  ;;  %v3873_v19 = vpop.f32.mrb[2].mxu1  ;;  %v3974_v37 = vadd.f32 %v3870_v12, %v1967_v38  ;;  %v3975_v1 = vadd.f32 %v2574_v29, %v1966_v2 }
 0x22d   : > { %v2586_v45 = vpop.f32.mrb[3].mxu1  ;;  %v4811_v8 = vrot.slane %v1944_v54, %v4776_v56  ;;  %v4814_v49 = vrot.slane %v1944_v54, %v4780_v27  ;;  %v4817_v9 = vrot.slane %v1944_v54, %v4782_v60  ;;  %v4820_v10 = vrot.slane %v1944_v54, %v4784_v33 }
 0x22e   : > { %v4823_v53 = vrot.slane %v1944_v54, %v4786_v11  ;;  %v4826_v7 = vrot.slane %v1944_v54, %v4789_v58  ;;  %v4829_v6 = vrot.slane %v1944_v54, %v4791_v62  ;;  %v4832_v20 = vrot.slane %v1943_v15, %v4776_v56 }
 0x22f   : > { %2704 = vbcast.lane.b32.xlu0 %v2698_v16, 264  ;;  %2700 = vbcast.lane.b32.xlu1 %v2698_v16, 256  ;;  %v4835_v35 = vrot.slane %v1943_v15, %v4780_v27  ;;  %v4838_v44 = vrot.slane %v1943_v15, %v4782_v60  ;;  %v4841_v32 = vrot.slane %v1943_v15, %v4784_v33 }
 0x230   : > { %v3976_v28 = vadd.f32 %v3873_v19, %v1969_v14  ;;  %v4844_v18 = vrot.slane %v1943_v15, %v4786_v11  ;;  %v3977_v52 = vadd.f32 %v2586_v45, %v1968_v4  ;;  %v4847_v48 = vrot.slane %v1943_v15, %v4789_v58 }
 0x231   : > { %v4850_v57 = vrot.slane %v1943_v15, %v4791_v62  ;;  %v3001_v5 = vcombine.high %v3974_v37, %v3974_v37  ;;  %v3008_v21 = vrot.slane %v3974_v37, %v4778_v41  ;;  %v2952_v31 = vcombine.high %v3975_v1, %v3975_v1 }
 0x232   : > { %v2959_v42 = vrot.slane %v3975_v1, %v4778_v41  ;;  %v3099_v46 = vcombine.high %v3976_v28, %v3976_v28  ;;  %v3106_v47 = vrot.slane %v3976_v28, %v4778_v41  ;;  %v3050_v51 = vcombine.high %v3977_v52, %v3977_v52 }
 0x233   : > { %2715 = vbcast.lane.b32.xlu0 %v2709_v40, 264  ;;  %2711 = vbcast.lane.b32.xlu1 %v2709_v40, 256  ;;  %v3015_v50 = vrot.slane %v3001_v5, %v4778_v41  ;;  %v3016_v22 = vcombine.high %v3008_v21, %v3008_v21  ;;  %v2966_v30 = vrot.slane %v2952_v31, %v4778_v41 }
 0x234   : > { %v4858_v26 = vrot.slane %v3977_v52, %v4778_v41  ;;  %v2967_v23 = vcombine.high %v2959_v42, %v2959_v42  ;;  %v3113_v59 = vrot.slane %v3099_v46, %v4778_v41  ;;  %v3114_v17 = vcombine.high %v3106_v47, %v3106_v47 }
 0x235   : > { %v4862_v24 = vrot.slane %v3050_v51, %v4778_v41  ;;  %v3024_v39 = vrot.slane %v3008_v21, %v4778_v41  ;;  %v3038_v61 = vrot.slane %v3016_v22, %v4778_v41  ;;  %v4869_v63 = vrot.slane %v1943_v15, %v4793_v55 }
 0x236   : > { %v3065_v12 = vcombine.high %v4858_v26, %v4858_v26  ;;  %v4872_v29 = vrot.slane %v1944_v54, %v4793_v55  ;;  %v3031_v0 = vrot.slane %v3015_v50, %v4778_v41  ;;  %v3017_v38 = vcombine.high %v3015_v50, %v3015_v50 }
 0x237   : > { %2726 = vbcast.lane.b32.xlu0 %v2720_v13, 264  ;;  %2722 = vbcast.lane.b32.xlu1 %v2720_v13, 256  ;;  %v4876_v2 = vrot.slane %v3024_v39, %v4776_v56  ;;  %v4879_v4 = vrot.slane %v3038_v61, %v4776_v56  ;;  %v3046_v14 = vcombine.high %v3024_v39, %v3024_v39 }
 0x238   : > { %v3048_v16 = vcombine.high %v3038_v61, %v3038_v61  ;;  %v4882_v40 = vrot.slane %v3031_v0, %v4776_v56  ;;  %v3045_v15 = vrot.slane %v3017_v38, %v4778_v41  ;;  %v3047_v19 = vcombine.high %v3031_v0, %v3031_v0 }
 0x239   : > { %v2975_v54 = vrot.slane %v2959_v42, %v4778_v41  ;;  %v4887_v13 = vrot.slane %v3046_v14, %v4776_v56  ;;  %v2989_v37 = vrot.slane %v2967_v23, %v4778_v41  ;;  %v2982_v42 = vrot.slane %v2966_v30, %v4778_v41 }
 0x23a   : > { %v4890_v45 = vrot.slane %v3048_v16, %v4776_v56  ;;  %v4894_v1 = vrot.slane %v3045_v15, %v4776_v56  ;;  %v4897_v28 = vrot.slane %v3047_v19, %v4776_v56  ;;  %v3049_v52 = vcombine.high %v3045_v15, %v3045_v15 }
 0x23b   : > { %2737 = vbcast.lane.b32.xlu0 %v2731_v36, 264  ;;  %2733 = vbcast.lane.b32.xlu1 %v2731_v36, 256  ;;  %v4900_v5 = vrot.slane %v2975_v54, %v4776_v56  ;;  %v4903_v36 = vrot.slane %v2989_v37, %v4776_v56  ;;  %v2997_v21 = vcombine.high %v2975_v54, %v2975_v54 }
 0x23c   : > { %v2999_v31 = vcombine.high %v2989_v37, %v2989_v37  ;;  %v4907_v46 = vrot.slane %v3049_v52, %v4776_v56  ;;  %v2968_v51 = vcombine.high %v2966_v30, %v2966_v30  ;;  %v3122_v50 = vrot.slane %v3106_v47, %v4778_v41 }
 0x23d   : > { %v3136_v22 = vrot.slane %v3114_v17, %v4778_v41  ;;  %v4914_v23 = vrot.slane %v2997_v21, %v4776_v56  ;;  %v4920_v61 = vrot.slane %v2982_v42, %v4776_v56  ;;  %v2998_v30 = vcombine.high %v2982_v42, %v2982_v42 }
 0x23e   : > { %v4917_v39 = vrot.slane %v2999_v31, %v4776_v56  ;;  %v2996_v0 = vrot.slane %v2968_v51, %v4778_v41  ;;  %v4924_v47 = vrot.slane %v3122_v50, %v4776_v56  ;;  %v3144_v38 = vcombine.high %v3122_v50, %v3122_v50 }
 0x23f   : > { %2748 = vbcast.lane.b32.xlu0 %v4802_v34, 264  ;;  %2744 = vbcast.lane.b32.xlu1 %v4802_v34, 256  ;;  %v4927_v17 = vrot.slane %v3136_v22, %v4776_v56  ;;  %v3146_v34 = vcombine.high %v3136_v22, %v3136_v22  ;;  %v3129_v14 = vrot.slane %v3113_v59, %v4778_v41 }
 0x240   : > { %v3115_v16 = vcombine.high %v3113_v59, %v3113_v59  ;;  %v4931_v15 = vrot.slane %v2996_v0, %v4776_v56  ;;  %v4934_v19 = vrot.slane %v2998_v30, %v4776_v56  ;;  %v3000_v54 = vcombine.high %v2996_v0, %v2996_v0 }
 0x241   : > { %v3073_v37 = vrot.slane %v4858_v26, %v4778_v41  ;;  %v4941_v52 = vrot.slane %v3144_v38, %v4776_v56  ;;  %v4944_v21 = vrot.slane %v3146_v34, %v4776_v56  ;;  %v4947_v59 = vrot.slane %v3129_v14, %v4776_v56 }
 0x242   : > { %v4950_v31 = vrot.slane %v3000_v54, %v4776_v56  ;;  %v3143_v42 = vrot.slane %v3115_v16, %v4778_v41  ;;  %v3145_v51 = vcombine.high %v3129_v14, %v3129_v14  ;;  %v3080_v22 = vrot.slane %v4862_v24, %v4778_v41 }
 0x243   : > { %2759 = vbcast.lane.b32.xlu0 %v4805_v25, 264  ;;  %2755 = vbcast.lane.b32.xlu1 %v4805_v25, 256  ;;  %v4954_v26 = vrot.slane %v3073_v37, %v4776_v56  ;;  %v3087_v25 = vrot.slane %v3065_v12, %v4778_v41  ;;  %v3095_v50 = vcombine.high %v3073_v37, %v3073_v37 }
 0x244   : > { %v3066_v0 = vcombine.high %v4862_v24, %v4862_v24  ;;  %v4962_v30 = vrot.slane %v3143_v42, %v4776_v56  ;;  %v4965_v38 = vrot.slane %v3145_v51, %v4776_v56  ;;  %v3147_v34 = vcombine.high %v3143_v42, %v3143_v42 }
 0x245   : > { %v4970_v12 = vrot.slane %v3087_v25, %v4776_v56  ;;  %v4973_v14 = vrot.slane %v3095_v50, %v4776_v56  ;;  %v3097_v16 = vcombine.high %v3087_v25, %v3087_v25  ;;  %v4976_v24 = vrot.slane %v3080_v22, %v4776_v56 }
 0x246   : > { %v3094_v54 = vrot.slane %v3066_v0, %v4778_v41  ;;  %v3096_v37 = vcombine.high %v3080_v22, %v3080_v22  ;;  %v4980_v51 = vrot.slane %v3147_v34, %v4776_v56  ;;  %v2599_v42 = vrot.slane %v4795_v3, %v4776_v56 }
 0x247   : > { %2770 = vbcast.lane.b32.xlu0 %v4808_v43, 264  ;;  %2766 = vbcast.lane.b32.xlu1 %v4808_v43, 256  ;;  %5265 = vst [vmem:[#allocation2_spill] sm:$0xff] %v4970_v12  ;;  %v4985_v43 = vrot.slane %v3097_v16, %v4776_v56  ;;  %v2610_v22 = vrot.slane %v4795_v3, %v4780_v27 }
 0x248   : > { %v4988_v12 = vrot.slane %v3094_v54, %v4776_v56  ;;  %v4991_v25 = vrot.slane %v3096_v37, %v4776_v56  ;;  %v3098_v50 = vcombine.high %v3094_v54, %v3094_v54  ;;  %v2621_v0 = vrot.slane %v4795_v3, %v4782_v60 }
 0x249   : > { %v2632_v34 = vrot.slane %v4795_v3, %v4784_v33  ;;  %v2643_v16 = vrot.slane %v4795_v3, %v4786_v11  ;;  %v2665_v27 = vrot.slane %v4795_v3, %v4791_v62  ;;  %v2676_v60 = vrot.slane %v4795_v3, %v4793_v55 }
 0x24a   : > { %v4994_v41 = vrot.slane %v3098_v50, %v4776_v56  ;;  %v2654_v56 = vrot.slane %v4795_v3, %v4789_v58 }
 0x24b   : > { %2605 = vbcast.lane.b32.xlu0 %v2599_v42, 264  ;;  %2601 = vbcast.lane.b32.xlu1 %v2599_v42, 256 }
 0x24f   : > { %2616 = vbcast.lane.b32.xlu0 %v2610_v22, 264  ;;  %2612 = vbcast.lane.b32.xlu1 %v2610_v22, 256 }
 0x253   : > { %2627 = vbcast.lane.b32.xlu0 %v2621_v0, 264  ;;  %2623 = vbcast.lane.b32.xlu1 %v2621_v0, 256 }
 0x257   : > { %2638 = vbcast.lane.b32.xlu0 %v2632_v34, 264  ;;  %2634 = vbcast.lane.b32.xlu1 %v2632_v34, 256 }
 0x25b   : > { %2649 = vbcast.lane.b32.xlu0 %v2643_v16, 264  ;;  %2645 = vbcast.lane.b32.xlu1 %v2643_v16, 256 }
 0x25f   : > { %2660 = vbcast.lane.b32.xlu0 %v2654_v56, 264  ;;  %2656 = vbcast.lane.b32.xlu1 %v2654_v56, 256 }
 0x263   : > { %2671 = vbcast.lane.b32.xlu0 %v2665_v27, 264  ;;  %2667 = vbcast.lane.b32.xlu1 %v2665_v27, 256 }
 0x267   : > { %2682 = vbcast.lane.b32.xlu0 %v2676_v60, 264  ;;  %2678 = vbcast.lane.b32.xlu1 %v2676_v60, 256 }
 0x26b   : > { %2869 = vbcast.lane.b32.xlu0 %v4811_v8, 264  ;;  %2865 = vbcast.lane.b32.xlu1 %v4811_v8, 256 }
 0x26f   : > { %2880 = vbcast.lane.b32.xlu0 %v4814_v49, 264  ;;  %2876 = vbcast.lane.b32.xlu1 %v4814_v49, 256 }
 0x273   : > { %2891 = vbcast.lane.b32.xlu0 %v4817_v9, 264  ;;  %2887 = vbcast.lane.b32.xlu1 %v4817_v9, 256 }
 0x277   : > { %2902 = vbcast.lane.b32.xlu0 %v4820_v10, 264  ;;  %2898 = vbcast.lane.b32.xlu1 %v4820_v10, 256 }
 0x27b   : > { %2913 = vbcast.lane.b32.xlu0 %v4823_v53, 264  ;;  %2909 = vbcast.lane.b32.xlu1 %v4823_v53, 256 }
 0x27f   : > { %2924 = vbcast.lane.b32.xlu0 %v4826_v7, 264  ;;  %2920 = vbcast.lane.b32.xlu1 %v4826_v7, 256 }
 0x283   : > { %2935 = vbcast.lane.b32.xlu0 %v4829_v6, 264  ;;  %2931 = vbcast.lane.b32.xlu1 %v4829_v6, 256 }
 0x287   : > { %2781 = vbcast.lane.b32.xlu0 %v4832_v20, 264  ;;  %2777 = vbcast.lane.b32.xlu1 %v4832_v20, 256 }
 0x28b   : > { %2792 = vbcast.lane.b32.xlu0 %v4835_v35, 264  ;;  %2788 = vbcast.lane.b32.xlu1 %v4835_v35, 256 }
 0x28f   : > { %2803 = vbcast.lane.b32.xlu0 %v4838_v44, 264  ;;  %2799 = vbcast.lane.b32.xlu1 %v4838_v44, 256 }
 0x293   : > { %2814 = vbcast.lane.b32.xlu0 %v4841_v32, 264  ;;  %2810 = vbcast.lane.b32.xlu1 %v4841_v32, 256 }
 0x297   : > { %2825 = vbcast.lane.b32.xlu0 %v4844_v18, 264  ;;  %2821 = vbcast.lane.b32.xlu1 %v4844_v18, 256 }
 0x29b   : > { %2836 = vbcast.lane.b32.xlu0 %v4847_v48, 264  ;;  %2832 = vbcast.lane.b32.xlu1 %v4847_v48, 256 }
 0x29d   : > { %v2694_v33 = vpop.permute.xlu0 %2693  ;;  %v2690_v11 = vpop.permute.xlu1 %2689 }
 0x29e   : > { %v3325_v58 = vadd.f32 %v4876_v2, %v2694_v33  ;;  %v3324_v62 = vadd.f32 %v4876_v2, %v2690_v11 }
 0x29f   : > { %2847 = vbcast.lane.b32.xlu0 %v4850_v57, 264  ;;  %2843 = vbcast.lane.b32.xlu1 %v4850_v57, 256 }
 0x2a0   : > { %3390 = vst.msk [vmem:[%s5040_s15 + $0x88] sm:$0xff] %vm3372_vm5, %v3325_v58  ;;  %3389 = vst.msk [vmem:[%s5040_s15 + $0x80] sm:$0xff] %vm3372_vm5, %v3324_v62 }
 0x2a1   : > { %v2705_v55 = vpop.permute.xlu0 %2704  ;;  %v2701_v3 = vpop.permute.xlu1 %2700 }
 0x2a2   : > { %v3327_v8 = vadd.f32 %v4879_v4, %v2705_v55  ;;  %v3326_v49 = vadd.f32 %v4879_v4, %v2701_v3 }
 0x2a3   : > { %2858 = vbcast.lane.b32.xlu0 %v4869_v63, 264  ;;  %2854 = vbcast.lane.b32.xlu1 %v4869_v63, 256 }
 0x2a4   : > { %3392 = vst.msk [vmem:[%s5040_s15 + $0x98] sm:$0xff] %vm3372_vm5, %v3327_v8  ;;  %3391 = vst.msk [vmem:[%s5040_s15 + $0x90] sm:$0xff] %vm3372_vm5, %v3326_v49 }
 0x2a5   : > { %v2716_v9 = vpop.permute.xlu0 %2715  ;;  %v2712_v10 = vpop.permute.xlu1 %2711 }
 0x2a6   : > { %v3329_v53 = vadd.f32 %v4887_v13, %v2716_v9  ;;  %v3328_v7 = vadd.f32 %v4887_v13, %v2712_v10 }
 0x2a7   : > { %2946 = vbcast.lane.b32.xlu0 %v4872_v29, 264  ;;  %2942 = vbcast.lane.b32.xlu1 %v4872_v29, 256 }
 0x2a8   : > { %3394 = vst.msk [vmem:[%s5040_s15 + $0xa8] sm:$0xff] %vm3372_vm5, %v3329_v53  ;;  %3393 = vst.msk [vmem:[%s5040_s15 + $0xa0] sm:$0xff] %vm3372_vm5, %v3328_v7 }
 0x2a9   : > { %v2727_v6 = vpop.permute.xlu0 %2726  ;;  %v2723_v20 = vpop.permute.xlu1 %2722 }
 0x2aa   : > { %v3331_v35 = vadd.f32 %v4890_v45, %v2727_v6  ;;  %v3330_v44 = vadd.f32 %v4890_v45, %v2723_v20 }
 0x2ac   : > { %3396 = vst.msk [vmem:[%s5040_s15 + $0xb8] sm:$0xff] %vm3372_vm5, %v3331_v35  ;;  %3395 = vst.msk [vmem:[%s5040_s15 + $0xb0] sm:$0xff] %vm3372_vm5, %v3330_v44 }
 0x2ad   : > { %v2738_v32 = vpop.permute.xlu0 %2737  ;;  %v2734_v18 = vpop.permute.xlu1 %2733 }
 0x2ae   : > { %v3333_v48 = vadd.f32 %v4882_v40, %v2738_v32  ;;  %v3332_v57 = vadd.f32 %v4882_v40, %v2734_v18 }
 0x2b0   : > { %3398 = vst.msk [vmem:[%s5040_s15 + $0xc8] sm:$0xff] %vm3372_vm5, %v3333_v48  ;;  %3397 = vst.msk [vmem:[%s5040_s15 + $0xc0] sm:$0xff] %vm3372_vm5, %v3332_v57 }
 0x2b1   : > { %v2749_v63 = vpop.permute.xlu0 %2748  ;;  %v2745_v29 = vpop.permute.xlu1 %2744 }
 0x2b2   : > { %v3335_v2 = vadd.f32 %v4894_v1, %v2749_v63  ;;  %v3334_v4 = vadd.f32 %v4894_v1, %v2745_v29 }
 0x2b4   : > { %3400 = vst.msk [vmem:[%s5040_s15 + $0xd8] sm:$0xff] %vm3372_vm5, %v3335_v2  ;;  %3399 = vst.msk [vmem:[%s5040_s15 + $0xd0] sm:$0xff] %vm3372_vm5, %v3334_v4 }
 0x2b5   : > { %v2760_v13 = vpop.permute.xlu0 %2759  ;;  %v2756_v45 = vpop.permute.xlu1 %2755 }
 0x2b6   : > { %v3337_v40 = vadd.f32 %v4897_v28, %v2760_v13  ;;  %v3336_v54 = vadd.f32 %v4897_v28, %v2756_v45 }
 0x2b8   : > { %3402 = vst.msk [vmem:[%s5040_s15 + $0xe8] sm:$0xff] %vm3372_vm5, %v3337_v40  ;;  %3401 = vst.msk [vmem:[%s5040_s15 + $0xe0] sm:$0xff] %vm3372_vm5, %v3336_v54 }
 0x2b9   : > { %v2771_v37 = vpop.permute.xlu0 %2770  ;;  %v2767_v42 = vpop.permute.xlu1 %2766 }
 0x2ba   : > { %v3339_v1 = vadd.f32 %v4907_v46, %v2771_v37  ;;  %v3338_v50 = vadd.f32 %v4907_v46, %v2767_v42 }
 0x2bc   : > { %3404 = vst.msk [vmem:[%s5040_s15 + $0xf8] sm:$0xff] %vm3372_vm5, %v3339_v1  ;;  %3403 = vst.msk [vmem:[%s5040_s15 + $0xf0] sm:$0xff] %vm3372_vm5, %v3338_v50 }
 0x2bd   : > { %v2606_v22 = vpop.permute.xlu0 %2605  ;;  %v2602_v0 = vpop.permute.xlu1 %2601 }
 0x2be   : > { %v3309_v28 = vadd.f32 %v4900_v5, %v2606_v22  ;;  %v3308_v34 = vadd.f32 %v4900_v5, %v2602_v0 }
 0x2c0   : > { %3374 = vst.msk [vmem:[%s5040_s15 + $0x8] sm:$0xff] %vm3372_vm5, %v3309_v28  ;;  %3373 = vst.msk [vmem:[%s5040_s15] sm:$0xff] %vm3372_vm5, %v3308_v34 }
 0x2c1   : > { %v2617_v16 = vpop.permute.xlu0 %2616  ;;  %v2613_v56 = vpop.permute.xlu1 %2612 }
 0x2c2   : > { %v3311_v46 = vadd.f32 %v4903_v36, %v2617_v16  ;;  %v3310_v27 = vadd.f32 %v4903_v36, %v2613_v56 }
 0x2c4   : > { %3376 = vst.msk [vmem:[%s5040_s15 + $0x18] sm:$0xff] %vm3372_vm5, %v3311_v46  ;;  %3375 = vst.msk [vmem:[%s5040_s15 + $0x10] sm:$0xff] %vm3372_vm5, %v3310_v27 }
 0x2c5   : > { %v2628_v60 = vpop.permute.xlu0 %2627  ;;  %v2624_v33 = vpop.permute.xlu1 %2623 }
 0x2c6   : > { %v3313_v5 = vadd.f32 %v4914_v23, %v2628_v60  ;;  %v3312_v11 = vadd.f32 %v4914_v23, %v2624_v33 }
 0x2c8   : > { %3378 = vst.msk [vmem:[%s5040_s15 + $0x28] sm:$0xff] %vm3372_vm5, %v3313_v5  ;;  %3377 = vst.msk [vmem:[%s5040_s15 + $0x20] sm:$0xff] %vm3372_vm5, %v3312_v11 }
 0x2c9   : > { %v2639_v58 = vpop.permute.xlu0 %2638  ;;  %v2635_v62 = vpop.permute.xlu1 %2634 }
 0x2ca   : > { %v3315_v36 = vadd.f32 %v4917_v39, %v2639_v58  ;;  %v3314_v55 = vadd.f32 %v4917_v39, %v2635_v62 }
 0x2cc   : > { %3380 = vst.msk [vmem:[%s5040_s15 + $0x38] sm:$0xff] %vm3372_vm5, %v3315_v36  ;;  %3379 = vst.msk [vmem:[%s5040_s15 + $0x30] sm:$0xff] %vm3372_vm5, %v3314_v55 }
 0x2cd   : > { %v2650_v3 = vpop.permute.xlu0 %2649  ;;  %v2646_v8 = vpop.permute.xlu1 %2645 }
 0x2ce   : > { %v3317_v23 = vadd.f32 %v4920_v61, %v2650_v3  ;;  %v3316_v49 = vadd.f32 %v4920_v61, %v2646_v8 }
 0x2d0   : > { %3382 = vst.msk [vmem:[%s5040_s15 + $0x48] sm:$0xff] %vm3372_vm5, %v3317_v23  ;;  %3381 = vst.msk [vmem:[%s5040_s15 + $0x40] sm:$0xff] %vm3372_vm5, %v3316_v49 }
 0x2d1   : > { %v2661_v9 = vpop.permute.xlu0 %2660  ;;  %v2657_v10 = vpop.permute.xlu1 %2656 }
 0x2d2   : > { %v3319_v39 = vadd.f32 %v4931_v15, %v2661_v9  ;;  %v3318_v53 = vadd.f32 %v4931_v15, %v2657_v10 }
 0x2d4   : > { %3384 = vst.msk [vmem:[%s5040_s15 + $0x58] sm:$0xff] %vm3372_vm5, %v3319_v39  ;;  %3383 = vst.msk [vmem:[%s5040_s15 + $0x50] sm:$0xff] %vm3372_vm5, %v3318_v53 }
 0x2d5   : > { %v2672_v7 = vpop.permute.xlu0 %2671  ;;  %v2668_v6 = vpop.permute.xlu1 %2667 }
 0x2d6   : > { %v3321_v61 = vadd.f32 %v4934_v19, %v2672_v7  ;;  %v3320_v20 = vadd.f32 %v4934_v19, %v2668_v6 }
 0x2d8   : > { %3386 = vst.msk [vmem:[%s5040_s15 + $0x68] sm:$0xff] %vm3372_vm5, %v3321_v61  ;;  %3385 = vst.msk [vmem:[%s5040_s15 + $0x60] sm:$0xff] %vm3372_vm5, %v3320_v20 }
 0x2d9   : > { %v2683_v35 = vpop.permute.xlu0 %2682  ;;  %v2679_v44 = vpop.permute.xlu1 %2678 }
 0x2da   : > { %v3323_v15 = vadd.f32 %v4950_v31, %v2683_v35  ;;  %v3322_v32 = vadd.f32 %v4950_v31, %v2679_v44 }
 0x2dc   : > { %3388 = vst.msk [vmem:[%s5040_s15 + $0x78] sm:$0xff] %vm3372_vm5, %v3323_v15  ;;  %3387 = vst.msk [vmem:[%s5040_s15 + $0x70] sm:$0xff] %vm3372_vm5, %v3322_v32 }
 0x2dd   : > { %v2870_v18 = vpop.permute.xlu0 %2869  ;;  %v2866_v48 = vpop.permute.xlu1 %2865 }
 0x2de   : > { %v3357_v19 = vadd.f32 %v4924_v47, %v2870_v18  ;;  %v3356_v57 = vadd.f32 %v4924_v47, %v2866_v48 }
 0x2e0   : > { %3422 = vst.msk [vmem:[%s5040_s15 + $0x188] sm:$0xff] %vm3372_vm5, %v3357_v19  ;;  %3421 = vst.msk [vmem:[%s5040_s15 + $0x180] sm:$0xff] %vm3372_vm5, %v3356_v57 }
 0x2e1   : > { %v2881_v63 = vpop.permute.xlu0 %2880  ;;  %v2877_v29 = vpop.permute.xlu1 %2876 }
 0x2e2   : > { %v3359_v31 = vadd.f32 %v4927_v17, %v2881_v63  ;;  %v3358_v2 = vadd.f32 %v4927_v17, %v2877_v29 }
 0x2e4   : > { %3424 = vst.msk [vmem:[%s5040_s15 + $0x198] sm:$0xff] %vm3372_vm5, %v3359_v31  ;;  %3423 = vst.msk [vmem:[%s5040_s15 + $0x190] sm:$0xff] %vm3372_vm5, %v3358_v2 }
 0x2e5   : > { %v2892_v4 = vpop.permute.xlu0 %2891  ;;  %v2888_v13 = vpop.permute.xlu1 %2887 }
 0x2e6   : > { %v3361_v47 = vadd.f32 %v4941_v52, %v2892_v4  ;;  %v3360_v45 = vadd.f32 %v4941_v52, %v2888_v13 }
 0x2e8   : > { %3426 = vst.msk [vmem:[%s5040_s15 + $0x1a8] sm:$0xff] %vm3372_vm5, %v3361_v47  ;;  %3425 = vst.msk [vmem:[%s5040_s15 + $0x1a0] sm:$0xff] %vm3372_vm5, %v3360_v45 }
 0x2e9   : > { %v2903_v40 = vpop.permute.xlu0 %2902  ;;  %v2899_v54 = vpop.permute.xlu1 %2898 }
 0x2ea   : > { %v3363_v17 = vadd.f32 %v4944_v21, %v2903_v40  ;;  %v3362_v37 = vadd.f32 %v4944_v21, %v2899_v54 }
 0x2ec   : > { %3428 = vst.msk [vmem:[%s5040_s15 + $0x1b8] sm:$0xff] %vm3372_vm5, %v3363_v17  ;;  %3427 = vst.msk [vmem:[%s5040_s15 + $0x1b0] sm:$0xff] %vm3372_vm5, %v3362_v37 }
 0x2ed   : > { %v2914_v42 = vpop.permute.xlu0 %2913  ;;  %v2910_v1 = vpop.permute.xlu1 %2909 }
 0x2ee   : > { %v3365_v52 = vadd.f32 %v4947_v59, %v2914_v42  ;;  %v3364_v50 = vadd.f32 %v4947_v59, %v2910_v1 }
 0x2f0   : > { %3430 = vst.msk [vmem:[%s5040_s15 + $0x1c8] sm:$0xff] %vm3372_vm5, %v3365_v52  ;;  %3429 = vst.msk [vmem:[%s5040_s15 + $0x1c0] sm:$0xff] %vm3372_vm5, %v3364_v50 }
 0x2f1   : > { %v2925_v22 = vpop.permute.xlu0 %2924  ;;  %v2921_v0 = vpop.permute.xlu1 %2920 }
 0x2f2   : > { %v3367_v21 = vadd.f32 %v4962_v30, %v2925_v22  ;;  %v3366_v28 = vadd.f32 %v4962_v30, %v2921_v0 }
 0x2f4   : > { %3432 = vst.msk [vmem:[%s5040_s15 + $0x1d8] sm:$0xff] %vm3372_vm5, %v3367_v21  ;;  %3431 = vst.msk [vmem:[%s5040_s15 + $0x1d0] sm:$0xff] %vm3372_vm5, %v3366_v28 }
 0x2f5   : > { %v2936_v34 = vpop.permute.xlu0 %2935  ;;  %v2932_v16 = vpop.permute.xlu1 %2931 }
 0x2f6   : > { %v3369_v59 = vadd.f32 %v4965_v38, %v2936_v34  ;;  %v3368_v56 = vadd.f32 %v4965_v38, %v2932_v16  ;;  %v5266_v38 = vld [vmem:[#allocation2_spill] sm:$0xff] }
 0x2f8   : > { %3434 = vst.msk [vmem:[%s5040_s15 + $0x1e8] sm:$0xff] %vm3372_vm5, %v3369_v59  ;;  %3433 = vst.msk [vmem:[%s5040_s15 + $0x1e0] sm:$0xff] %vm3372_vm5, %v3368_v56 }
 0x2f9   : > { %v2782_v46 = vpop.permute.xlu0 %2781  ;;  %v2778_v27 = vpop.permute.xlu1 %2777 }
 0x2fa   : > { %v3341_v30 = vadd.f32 %v4954_v26, %v2782_v46  ;;  %v3340_v60 = vadd.f32 %v4954_v26, %v2778_v27 }
 0x2fc   : > { %3406 = vst.msk [vmem:[%s5040_s15 + $0x108] sm:$0xff] %vm3372_vm5, %v3341_v30  ;;  %3405 = vst.msk [vmem:[%s5040_s15 + $0x100] sm:$0xff] %vm3372_vm5, %v3340_v60 }
 0x2fd   : > { %v2793_v33 = vpop.permute.xlu0 %2792  ;;  %v2789_v5 = vpop.permute.xlu1 %2788 }
 0x2fe   : > { %v3343_v11 = vadd.f32 %v5266_v38, %v2793_v33  ;;  %v3342_v58 = vadd.f32 %v5266_v38, %v2789_v5 }
 0x300   : > { %3408 = vst.msk [vmem:[%s5040_s15 + $0x118] sm:$0xff] %vm3372_vm5, %v3343_v11  ;;  %3407 = vst.msk [vmem:[%s5040_s15 + $0x110] sm:$0xff] %vm3372_vm5, %v3342_v58 }
 0x301   : > { %v2804_v62 = vpop.permute.xlu0 %2803  ;;  %v2800_v36 = vpop.permute.xlu1 %2799 }
 0x302   : > { %v3345_v26 = vadd.f32 %v4973_v14, %v2804_v62  ;;  %v3344_v55 = vadd.f32 %v4973_v14, %v2800_v36 }
 0x304   : > { %3410 = vst.msk [vmem:[%s5040_s15 + $0x128] sm:$0xff] %vm3372_vm5, %v3345_v26  ;;  %3409 = vst.msk [vmem:[%s5040_s15 + $0x120] sm:$0xff] %vm3372_vm5, %v3344_v55 }
 0x305   : > { %v2815_v3 = vpop.permute.xlu0 %2814  ;;  %v2811_v8 = vpop.permute.xlu1 %2810 }
 0x306   : > { %v3347_v23 = vadd.f32 %v4985_v43, %v2815_v3  ;;  %v3346_v49 = vadd.f32 %v4985_v43, %v2811_v8 }
 0x308   : > { %3412 = vst.msk [vmem:[%s5040_s15 + $0x138] sm:$0xff] %vm3372_vm5, %v3347_v23  ;;  %3411 = vst.msk [vmem:[%s5040_s15 + $0x130] sm:$0xff] %vm3372_vm5, %v3346_v49 }
 0x309   : > { %v2826_v9 = vpop.permute.xlu0 %2825  ;;  %v2822_v10 = vpop.permute.xlu1 %2821 }
 0x30a   : > { %v3349_v14 = vadd.f32 %v4976_v24, %v2826_v9  ;;  %v3348_v39 = vadd.f32 %v4976_v24, %v2822_v10 }
 0x30c   : > { %3414 = vst.msk [vmem:[%s5040_s15 + $0x148] sm:$0xff] %vm3372_vm5, %v3349_v14  ;;  %3413 = vst.msk [vmem:[%s5040_s15 + $0x140] sm:$0xff] %vm3372_vm5, %v3348_v39 }
 0x30d   : > { %v2837_v53 = vpop.permute.xlu0 %2836  ;;  %v2833_v7 = vpop.permute.xlu1 %2832 }
 0x30e   : > { %v3351_v43 = vadd.f32 %v4988_v12, %v2837_v53  ;;  %v3350_v6 = vadd.f32 %v4988_v12, %v2833_v7 }
 0x310   : > { %3416 = vst.msk [vmem:[%s5040_s15 + $0x158] sm:$0xff] %vm3372_vm5, %v3351_v43  ;;  %3415 = vst.msk [vmem:[%s5040_s15 + $0x150] sm:$0xff] %vm3372_vm5, %v3350_v6 }
 0x311   : > { %v2848_v61 = vpop.permute.xlu0 %2847  ;;  %v2844_v20 = vpop.permute.xlu1 %2843 }
 0x312   : > { %v3353_v24 = vadd.f32 %v4991_v25, %v2848_v61  ;;  %v3352_v35 = vadd.f32 %v4991_v25, %v2844_v20 }
 0x314   : > { %3418 = vst.msk [vmem:[%s5040_s15 + $0x168] sm:$0xff] %vm3372_vm5, %v3353_v24  ;;  %3417 = vst.msk [vmem:[%s5040_s15 + $0x160] sm:$0xff] %vm3372_vm5, %v3352_v35 }
 0x315   : > { %v2859_v44 = vpop.permute.xlu0 %2858  ;;  %v2855_v15 = vpop.permute.xlu1 %2854 }
 0x316   : > { %v3355_v12 = vadd.f32 %v4994_v41, %v2859_v44  ;;  %v3354_v32 = vadd.f32 %v4994_v41, %v2855_v15 }
 0x318   : > { %3420 = vst.msk [vmem:[%s5040_s15 + $0x178] sm:$0xff] %vm3372_vm5, %v3355_v12  ;;  %3419 = vst.msk [vmem:[%s5040_s15 + $0x170] sm:$0xff] %vm3372_vm5, %v3354_v32 }
 0x319   : > { %v2947_v18 = vpop.permute.xlu0 %2946  ;;  %v2943_v48 = vpop.permute.xlu1 %2942 }
 0x31a   : > { %v3371_v19 = vadd.f32 %v4980_v51, %v2947_v18  ;;  %v3370_v25 = vadd.f32 %v4980_v51, %v2943_v48 }
 0x31c   : > { %3436 = vst.msk [vmem:[%s5040_s15 + $0x1f8] sm:$0xff] %vm3372_vm5, %v3371_v19  ;;  %3435 = vst.msk [vmem:[%s5040_s15 + $0x1f0] sm:$0xff] %vm3372_vm5, %v3370_v25 }
 0x31d PF: > { %s16_s23 = sadd.s32 1, %s4109_s23   ;;  %s5267_s21 = smov %s4105_s22 }
 0x31e   : > { %p13_p6 = scmp.ge.s32.totalorder %s16_s23, 4   ;;  %s5268_s22 = smov %s5270_s24 }
 0x320   :  { %15 = sbr.rel (!%p13_p6) target bundleno = 2 (0x2), region = 83 }

</bundles_post_ra>
